<compile_context>
chip_gen: v7x
topology: tpu7x:2x2x1
jax: 0.10.0
libtpu: 0.0.40
codegen_flags: <defaults>
</compile_context>

<pallas_src>
import functools

import jax
import jax.numpy as jnp
from jax.experimental import pallas as pl
from jax.experimental.pallas import tpu as pltpu

LN_EPS = 1e-5


def _layernorm(x, gamma, beta):
    mu = jnp.mean(x, axis=-1, keepdims=True)
    var = jnp.mean((x - mu) ** 2, axis=-1, keepdims=True)
    return (x - mu) * jax.lax.rsqrt(var + LN_EPS) * gamma + beta


# --------------------------------------------------------------------------
# Fused kernel: grid step l == transformer block l; last step also does the
# retrieval head + cross-entropy.  Activation lives in VMEM scratch.
# --------------------------------------------------------------------------
def fused_kernel(x_ref, lab_ref,
                 g1_ref, be1_ref,
                 wqkv_ref, bqkv_ref,
                 wo_ref, bo_ref,
                 g2_ref, be2_ref,
                 w1_ref, bf1_ref, w2_ref, bf2_ref,
                 wh_ref, bh_ref,
                 logits_ref, loss_ref,
                 x_vmem, *, n_heads):
    l = pl.program_id(0)
    L = pl.num_programs(0)
    B, T, D = x_ref.shape
    hd = D // n_heads
    scale = 1.0 / (float(hd) ** 0.5)

    @pl.when(l == 0)
    def _init():
        x_vmem[...] = x_ref[...].reshape(B * T, D)
        logits_ref[...] = jnp.zeros_like(logits_ref)
        loss_ref[...] = jnp.zeros_like(loss_ref)

    x = x_vmem[...]                                            # (B*T, D)

    # ---- seq_layernorm + multi-head self-attention (fused QKV projection) ----
    xn = _layernorm(x, g1_ref[0, 0], be1_ref[0, 0])
    qkv = jnp.dot(xn, wqkv_ref[0], preferred_element_type=jnp.float32) + bqkv_ref[0, 0]
    q3 = (qkv[:, 0 * D:1 * D] * scale).reshape(B, T, D)        # fold 1/sqrt(hd) into q
    k3 = qkv[:, 1 * D:2 * D].reshape(B, T, D)
    v3 = qkv[:, 2 * D:3 * D].reshape(B, T, D)

    ctx_heads = []
    for h in range(n_heads):              # static unroll: scores are inherently per-head
        sl = slice(h * hd, (h + 1) * hd)
        s = jnp.einsum('bqd,bkd->bqk', q3[:, :, sl], k3[:, :, sl],
                       preferred_element_type=jnp.float32)
        s = s - jnp.max(s, axis=-1, keepdims=True)
        e = jnp.exp(s)
        p = e / jnp.sum(e, axis=-1, keepdims=True)
        ctx_heads.append(jnp.einsum('bqk,bkd->bqd', p, v3[:, :, sl],
                                    preferred_element_type=jnp.float32))
    ctx = jnp.concatenate(ctx_heads, axis=-1).reshape(B * T, D)

    attn = jnp.dot(ctx, wo_ref[0], preferred_element_type=jnp.float32) + bo_ref[0, 0]
    x1 = attn + x                                              # residual

    # ---- patch_layernorm + feed-forward ----
    x1n = _layernorm(x1, g2_ref[0, 0], be2_ref[0, 0])
    hid = jnp.dot(x1n, w1_ref[0], preferred_element_type=jnp.float32) + bf1_ref[0, 0]
    # TODO(synk): PyTorch nn.GELU defaults to exact erf; tanh approximation used here.
    hid = jax.nn.gelu(hid, approximate=True)
    y = jnp.dot(hid, w2_ref[0], preferred_element_type=jnp.float32) + bf2_ref[0, 0] + x1

    x_vmem[...] = y

    # ---- retrieval head (Linear dim->1) + CE over positions 1..T-1 (last layer only) ----
    @pl.when(l == L - 1)
    def _finish():
        w = wh_ref[0]                                          # (D,)
        y3 = y.reshape(B, T, D)
        logits = jnp.sum(y3 * w[None, None, :], axis=-1) + bh_ref[0, 0]   # (B, T)
        logits_ref[...] = logits.astype(logits_ref.dtype)

        pos = jax.lax.broadcasted_iota(jnp.int32, (B, T), 1)
        valid = pos >= 1                                       # classes are positions 1..T-1
        masked = jnp.where(valid, logits, jnp.float32(-1e30))
        m = jnp.max(masked, axis=-1, keepdims=True)            # (B, 1)
        e = jnp.where(valid, jnp.exp(masked - m), 0.0)
        lse = m + jnp.log(jnp.sum(e, axis=-1, keepdims=True))  # (B, 1)

        lab = jnp.clip(lab_ref[...], 0, T - 2)                 # (B, 1) int32, clamped
        pick = pos == (lab + 1)                                # label k -> position k+1
        picked = jnp.sum(jnp.where(pick, logits, 0.0), axis=-1, keepdims=True)

        per_ex = lse - picked                                  # (B, 1)
        loss_ref[...] = jnp.sum(per_ex, axis=0, keepdims=True) * (1.0 / B)


# --------------------------------------------------------------------------
# Full model wrapper: one pallas_call for everything.
# --------------------------------------------------------------------------
@functools.partial(jax.jit, static_argnames=("n_heads",))
def retrieval_transformer_forward(x, params, labels, n_heads):
    B, T, D = x.shape
    blk = params["blocks"]
    L = blk["wq"].shape[0]
    F = blk["w1"].shape[-1]
    labels2d = labels.astype(jnp.int32)[:, None]               # (B, 1)

    # Fuse Q/K/V weights & biases (one weight DMA + one MXU matmul per layer).
    wqkv = jnp.concatenate([blk["wq"], blk["wk"], blk["wv"]], axis=-1)   # (L, D, 3D)
    bqkv = jnp.concatenate([blk["bq"], blk["bk"], blk["bv"]], axis=-1)   # (L, 1, 3D)

    per_layer = lambda l: (l, 0, 0)
    const2 = lambda l: (0, 0)
    const3 = lambda l: (0, 0, 0)

    in_specs = [
        pl.BlockSpec((B, T, D), const3),        # x (only consumed at l == 0)
        pl.BlockSpec((B, 1), const2),           # labels
        pl.BlockSpec((1, 1, D), per_layer),     # ln1 gamma
        pl.BlockSpec((1, 1, D), per_layer),     # ln1 beta
        pl.BlockSpec((1, D, 3 * D), per_layer), # fused wqkv
        pl.BlockSpec((1, 1, 3 * D), per_layer), # fused bqkv
        pl.BlockSpec((1, D, D), per_layer),     # wo
        pl.BlockSpec((1, 1, D), per_layer),     # bo
        pl.BlockSpec((1, 1, D), per_layer),     # ln2 gamma
        pl.BlockSpec((1, 1, D), per_layer),     # ln2 beta
        pl.BlockSpec((1, D, F), per_layer),     # ff w1
        pl.BlockSpec((1, 1, F), per_layer),     # ff b1
        pl.BlockSpec((1, F, D), per_layer),     # ff w2
        pl.BlockSpec((1, 1, D), per_layer),     # ff b2
        pl.BlockSpec((1, D), const2),           # retrieval head weight
        pl.BlockSpec((1, 1), const2),           # retrieval head bias
    ]
    out_specs = (
        pl.BlockSpec((B, T), const2),           # logits (resident across layers)
        pl.BlockSpec((1, 1), const2),           # loss
    )

    logits, loss = pl.pallas_call(
        functools.partial(fused_kernel, n_heads=n_heads),
        out_shape=(jax.ShapeDtypeStruct((B, T), jnp.float32),
                   jax.ShapeDtypeStruct((1, 1), jnp.float32)),
        grid=(L,),
        in_specs=in_specs,
        out_specs=out_specs,
        scratch_shapes=[pltpu.VMEM((B * T, D), jnp.float32)],   # activation stays in VMEM
        compiler_params=pltpu.CompilerParams(
            dimension_semantics=("arbitrary",)),                # layers are sequential
    )(x, labels2d,
      blk["g1"], blk["be1"],
      wqkv, bqkv,
      blk["wo"], blk["bo"],
      blk["g2"], blk["be2"],
      blk["w1"], blk["bf1"], blk["w2"], blk["bf2"],
      params["w_head"], params["b_head"])

    output = logits[:, :, None]                                 # (B, T, 1) like PyTorch
    return loss[0, 0], output


def init_params(key, D, H, depth, ff_mult=4):
    del H  # heads are fused inside the (D, D) projection weights
    F = ff_mult * D
    s = 0.02
    key, k0, k1, k2, k3, k4, k5, kh = jax.random.split(key, 8)
    blocks = dict(
        g1=jnp.ones((depth, 1, D), jnp.float32),
        be1=jnp.zeros((depth, 1, D), jnp.float32),
        wq=s * jax.random.normal(k0, (depth, D, D), jnp.float32),
        bq=jnp.zeros((depth, 1, D), jnp.float32),
        wk=s * jax.random.normal(k1, (depth, D, D), jnp.float32),
        bk=jnp.zeros((depth, 1, D), jnp.float32),
        wv=s * jax.random.normal(k2, (depth, D, D), jnp.float32),
        bv=jnp.zeros((depth, 1, D), jnp.float32),
        wo=s * jax.random.normal(k3, (depth, D, D), jnp.float32),
        bo=jnp.zeros((depth, 1, D), jnp.float32),
        g2=jnp.ones((depth, 1, D), jnp.float32),
        be2=jnp.zeros((depth, 1, D), jnp.float32),
        w1=s * jax.random.normal(k4, (depth, D, F), jnp.float32),
        bf1=jnp.zeros((depth, 1, F), jnp.float32),
        w2=s * jax.random.normal(k5, (depth, F, D), jnp.float32),
        bf2=jnp.zeros((depth, 1, D), jnp.float32),
    )
    return dict(
        blocks=blocks,
        w_head=s * jax.random.normal(kh, (1, D), jnp.float32),
        b_head=jnp.zeros((1, 1), jnp.float32),
    )


if __name__ == "__main__":
    B, T, D, H, DEPTH = 2, 8, 32, 4, 2      # batch, seq(n_samples), dim, heads, depth

    key = jax.random.PRNGKey(0)
    kx, kl, kp = jax.random.split(key, 3)
    x = jax.random.normal(kx, (B, T, D), jnp.float32)
    labels = jax.random.randint(kl, (B,), 0, T - 1)   # classes = T-1 (output[..., 1:, :])
    params = init_params(kp, D, H, DEPTH)

    loss, output = retrieval_transformer_forward(x, params, labels, n_heads=H)
    loss, output = jax.block_until_ready((loss, output))

    assert output.shape == (B, T, 1)
    assert bool(jnp.isfinite(loss))
    print("KERNEL_OK")
</pallas_src>

<mosaic_0001>
module attributes {stable_mosaic.version = 11 : i64} {
  func.func @fused_kernel(%arg0: i32, %arg1: memref<2x8x32xf32, #tpu.memory_space<vmem>>, %arg2: memref<2x1xi32, #tpu.memory_space<vmem>>, %arg3: memref<1x1x32xf32, #tpu.memory_space<vmem>>, %arg4: memref<1x1x32xf32, #tpu.memory_space<vmem>>, %arg5: memref<1x32x96xf32, #tpu.memory_space<vmem>>, %arg6: memref<1x1x96xf32, #tpu.memory_space<vmem>>, %arg7: memref<1x32x32xf32, #tpu.memory_space<vmem>>, %arg8: memref<1x1x32xf32, #tpu.memory_space<vmem>>, %arg9: memref<1x1x32xf32, #tpu.memory_space<vmem>>, %arg10: memref<1x1x32xf32, #tpu.memory_space<vmem>>, %arg11: memref<1x32x128xf32, #tpu.memory_space<vmem>>, %arg12: memref<1x1x128xf32, #tpu.memory_space<vmem>>, %arg13: memref<1x128x32xf32, #tpu.memory_space<vmem>>, %arg14: memref<1x1x32xf32, #tpu.memory_space<vmem>>, %arg15: memref<1x32xf32, #tpu.memory_space<vmem>>, %arg16: memref<1x1xf32, #tpu.memory_space<vmem>>, %arg17: memref<2x8xf32, #tpu.memory_space<vmem>>, %arg18: memref<1x1xf32, #tpu.memory_space<vmem>>, %arg19: memref<16x32xf32, #tpu.memory_space<vmem>>) attributes {dimension_semantics = [#tpu.dimension_semantics<arbitrary>], iteration_bounds = array<i64: 2>, scalar_prefetch = 0 : i64, scratch_operands = 1 : i64, tpu.core_type = #tpu.core_type<tc>, window_params = [{pipeline_mode = #tpu.pipeline_mode<synchronous>, transform_indices = @transform_0, window_bounds = array<i64: 2, 8, 32>}, {pipeline_mode = #tpu.pipeline_mode<synchronous>, transform_indices = @transform_1, window_bounds = array<i64: 2, 1>}, {transform_indices = @transform_2, window_bounds = array<i64: 1, 1, 32>}, {transform_indices = @transform_3, window_bounds = array<i64: 1, 1, 32>}, {transform_indices = @transform_4, window_bounds = array<i64: 1, 32, 96>}, {transform_indices = @transform_5, window_bounds = array<i64: 1, 1, 96>}, {transform_indices = @transform_6, window_bounds = array<i64: 1, 32, 32>}, {transform_indices = @transform_7, window_bounds = array<i64: 1, 1, 32>}, {transform_indices = @transform_8, window_bounds = array<i64: 1, 1, 32>}, {transform_indices = @transform_9, window_bounds = array<i64: 1, 1, 32>}, {transform_indices = @transform_10, window_bounds = array<i64: 1, 32, 128>}, {transform_indices = @transform_11, window_bounds = array<i64: 1, 1, 128>}, {transform_indices = @transform_12, window_bounds = array<i64: 1, 128, 32>}, {transform_indices = @transform_13, window_bounds = array<i64: 1, 1, 32>}, {pipeline_mode = #tpu.pipeline_mode<synchronous>, transform_indices = @transform_14, window_bounds = array<i64: 1, 32>}, {pipeline_mode = #tpu.pipeline_mode<synchronous>, transform_indices = @transform_15, window_bounds = array<i64: 1, 1>}, {pipeline_mode = #tpu.pipeline_mode<synchronous>, transform_indices = @transform_16, window_bounds = array<i64: 2, 8>}, {pipeline_mode = #tpu.pipeline_mode<synchronous>, transform_indices = @transform_17, window_bounds = array<i64: 1, 1>}]} {
    %c0_i32 = arith.constant 0 : i32
    %0 = arith.cmpi eq, %arg0, %c0_i32 : i32
    %1 = arith.extui %0 : i1 to i32
    %c0_i32_0 = arith.constant 0 : i32
    %2 = arith.cmpi ne, %1, %c0_i32_0 : i32
    scf.if %2 {
      %c0_75 = arith.constant 0 : index
      %c0_76 = arith.constant 0 : index
      %c0_77 = arith.constant 0 : index
      %177 = vector.load %arg1[%c0_75, %c0_76, %c0_77] : memref<2x8x32xf32, #tpu.memory_space<vmem>>, vector<2x8x32xf32>
      %178 = vector.shape_cast %177 : vector<2x8x32xf32> to vector<16x32xf32>
      %c0_78 = arith.constant 0 : index
      %c0_79 = arith.constant 0 : index
      %179 = vector.load %arg19[%c0_78, %c0_79] : memref<16x32xf32, #tpu.memory_space<vmem>>, vector<16x32xf32>
      tpu.vector_store %arg19[%c0_78, %c0_79], %178 {strides = array<i32>} : memref<16x32xf32, #tpu.memory_space<vmem>>, vector<16x32xf32>,
      %cst_80 = arith.constant 0.000000e+00 : f32
      %180 = vector.broadcast %cst_80 : f32 to vector<2x8xf32>
      %c0_81 = arith.constant 0 : index
      %c0_82 = arith.constant 0 : index
      %181 = vector.load %arg17[%c0_81, %c0_82] : memref<2x8xf32, #tpu.memory_space<vmem>>, vector<2x8xf32>
      tpu.vector_store %arg17[%c0_81, %c0_82], %180 {strides = array<i32>} : memref<2x8xf32, #tpu.memory_space<vmem>>, vector<2x8xf32>,
      %cst_83 = arith.constant 0.000000e+00 : f32
      %182 = vector.broadcast %cst_83 : f32 to vector<1x1xf32>
      %c0_84 = arith.constant 0 : index
      %c0_85 = arith.constant 0 : index
      %183 = vector.load %arg18[%c0_84, %c0_85] : memref<1x1xf32, #tpu.memory_space<vmem>>, vector<1x1xf32>
      tpu.vector_store %arg18[%c0_84, %c0_85], %182 {strides = array<i32>} : memref<1x1xf32, #tpu.memory_space<vmem>>, vector<1x1xf32>,
    } else {
    }
    %c0 = arith.constant 0 : index
    %c0_1 = arith.constant 0 : index
    %3 = vector.load %arg19[%c0, %c0_1] : memref<16x32xf32, #tpu.memory_space<vmem>>, vector<16x32xf32>
    %c0_2 = arith.constant 0 : index
    %c0_3 = arith.constant 0 : index
    %c0_4 = arith.constant 0 : index
    %4 = vector.load %arg3[%c0_2, %c0_3, %c0_4] : memref<1x1x32xf32, #tpu.memory_space<vmem>>, vector<1x1x32xf32>
    %5 = vector.shape_cast %4 : vector<1x1x32xf32> to vector<32xf32>
    %c0_5 = arith.constant 0 : index
    %c0_6 = arith.constant 0 : index
    %c0_7 = arith.constant 0 : index
    %6 = vector.load %arg4[%c0_5, %c0_6, %c0_7] : memref<1x1x32xf32, #tpu.memory_space<vmem>>, vector<1x1x32xf32>
    %7 = vector.shape_cast %6 : vector<1x1x32xf32> to vector<32xf32>
    %cst = arith.constant dense<0.000000e+00> : vector<16xf32>
    %8 = vector.multi_reduction <add>, %3, %cst [1] : vector<16x32xf32> to vector<16xf32>
    %9 = vector.shape_cast %8 : vector<16xf32> to vector<16x1xf32>
    %cst_8 = arith.constant 3.200000e+01 : f32
    %10 = vector.broadcast %cst_8 : f32 to vector<16x1xf32>
    %11 = arith.divf %9, %10 : vector<16x1xf32>
    %12 = vector.broadcast %11 : vector<16x1xf32> to vector<16x32xf32>
    %13 = arith.subf %3, %12 : vector<16x32xf32>
    %14 = arith.mulf %13, %13 : vector<16x32xf32>
    %cst_9 = arith.constant dense<0.000000e+00> : vector<16xf32>
    %15 = vector.multi_reduction <add>, %14, %cst_9 [1] : vector<16x32xf32> to vector<16xf32>
    %16 = vector.shape_cast %15 : vector<16xf32> to vector<16x1xf32>
    %cst_10 = arith.constant 3.200000e+01 : f32
    %17 = vector.broadcast %cst_10 : f32 to vector<16x1xf32>
    %18 = arith.divf %16, %17 : vector<16x1xf32>
    %19 = vector.broadcast %11 : vector<16x1xf32> to vector<16x32xf32>
    %20 = arith.subf %3, %19 : vector<16x32xf32>
    %cst_11 = arith.constant 9.99999974E-6 : f32
    %21 = vector.broadcast %cst_11 : f32 to vector<16x1xf32>
    %22 = arith.addf %18, %21 : vector<16x1xf32>
    %23 = math.rsqrt %22 : vector<16x1xf32>
    %24 = vector.broadcast %23 : vector<16x1xf32> to vector<16x32xf32>
    %25 = arith.mulf %20, %24 : vector<16x32xf32>
    %26 = vector.shape_cast %5 : vector<32xf32> to vector<1x32xf32>
    %27 = vector.broadcast %26 : vector<1x32xf32> to vector<16x32xf32>
    %28 = arith.mulf %25, %27 : vector<16x32xf32>
    %29 = vector.shape_cast %7 : vector<32xf32> to vector<1x32xf32>
    %30 = vector.broadcast %29 : vector<1x32xf32> to vector<16x32xf32>
    %31 = arith.addf %28, %30 : vector<16x32xf32>
    %c0_12 = arith.constant 0 : index
    %c0_13 = arith.constant 0 : index
    %c0_14 = arith.constant 0 : index
    %32 = vector.load %arg5[%c0_12, %c0_13, %c0_14] : memref<1x32x96xf32, #tpu.memory_space<vmem>>, vector<1x32x96xf32>
    %33 = vector.shape_cast %32 : vector<1x32x96xf32> to vector<32x96xf32>
    %cst_15 = arith.constant dense<0.000000e+00> : vector<16x96xf32>
    %34 = tpu.matmul %31, %33, %cst_15 {dimension_numbers = #tpu.dot_dimension_numbers<[1], [0], [0], [1], [0, 0, 1, 1], [], []>} : vector<16x32xf32>, vector<32x96xf32>, vector<16x96xf32> -> vector<16x96xf32>
    %c0_16 = arith.constant 0 : index
    %c0_17 = arith.constant 0 : index
    %c0_18 = arith.constant 0 : index
    %35 = vector.load %arg6[%c0_16, %c0_17, %c0_18] : memref<1x1x96xf32, #tpu.memory_space<vmem>>, vector<1x1x96xf32>
    %36 = vector.shape_cast %35 : vector<1x1x96xf32> to vector<96xf32>
    %37 = vector.shape_cast %36 : vector<96xf32> to vector<1x96xf32>
    %38 = vector.broadcast %37 : vector<1x96xf32> to vector<16x96xf32>
    %39 = arith.addf %34, %38 : vector<16x96xf32>
    %40 = vector.extract_strided_slice %39 {offsets = [0, 0], sizes = [16, 32], strides = [1, 1]} : vector<16x96xf32> to vector<16x32xf32>
    %cst_19 = arith.constant 0.353553385 : f32
    %41 = vector.broadcast %cst_19 : f32 to vector<16x32xf32>
    %42 = arith.mulf %40, %41 : vector<16x32xf32>
    %43 = vector.shape_cast %42 : vector<16x32xf32> to vector<2x8x32xf32>
    %44 = vector.extract_strided_slice %39 {offsets = [0, 32], sizes = [16, 32], strides = [1, 1]} : vector<16x96xf32> to vector<16x32xf32>
    %45 = vector.shape_cast %44 : vector<16x32xf32> to vector<2x8x32xf32>
    %46 = vector.extract_strided_slice %39 {offsets = [0, 64], sizes = [16, 32], strides = [1, 1]} : vector<16x96xf32> to vector<16x32xf32>
    %47 = vector.shape_cast %46 : vector<16x32xf32> to vector<2x8x32xf32>
    %48 = vector.extract_strided_slice %43 {offsets = [0, 0, 0], sizes = [2, 8, 8], strides = [1, 1, 1]} : vector<2x8x32xf32> to vector<2x8x8xf32>
    %49 = vector.extract_strided_slice %45 {offsets = [0, 0, 0], sizes = [2, 8, 8], strides = [1, 1, 1]} : vector<2x8x32xf32> to vector<2x8x8xf32>
    "tpu.trace_start"() <{level = 10 : i32, message = "bqd,bkd->bqk"}> : () -> ()
    %cst_20 = arith.constant dense<0.000000e+00> : vector<2x8x8xf32>
    %50 = tpu.matmul %48, %49, %cst_20 {dimension_numbers = #tpu.dot_dimension_numbers<[2], [2], [1], [1], [0, 0, 0, 1, 1, 1], [0], [0]>} : vector<2x8x8xf32>, vector<2x8x8xf32>, vector<2x8x8xf32> -> vector<2x8x8xf32>
    "tpu.trace_stop"() : () -> ()
    %cst_21 = arith.constant dense<0xFF800000> : vector<2x8xf32>
    %51 = vector.multi_reduction <maximumf>, %50, %cst_21 [2] : vector<2x8x8xf32> to vector<2x8xf32>
    %52 = vector.shape_cast %51 : vector<2x8xf32> to vector<2x8x1xf32>
    %53 = vector.broadcast %52 : vector<2x8x1xf32> to vector<2x8x8xf32>
    %54 = arith.subf %50, %53 : vector<2x8x8xf32>
    %55 = math.exp %54 : vector<2x8x8xf32>
    %cst_22 = arith.constant dense<0.000000e+00> : vector<2x8xf32>
    %56 = vector.multi_reduction <add>, %55, %cst_22 [2] : vector<2x8x8xf32> to vector<2x8xf32>
    %57 = vector.shape_cast %56 : vector<2x8xf32> to vector<2x8x1xf32>
    %58 = vector.broadcast %57 : vector<2x8x1xf32> to vector<2x8x8xf32>
    %59 = arith.divf %55, %58 : vector<2x8x8xf32>
    %60 = vector.extract_strided_slice %47 {offsets = [0, 0, 0], sizes = [2, 8, 8], strides = [1, 1, 1]} : vector<2x8x32xf32> to vector<2x8x8xf32>
    "tpu.trace_start"() <{level = 10 : i32, message = "bqk,bkd->bqd"}> : () -> ()
    %cst_23 = arith.constant dense<0.000000e+00> : vector<2x8x8xf32>
    %61 = tpu.matmul %59, %60, %cst_23 {dimension_numbers = #tpu.dot_dimension_numbers<[2], [1], [1], [2], [0, 0, 0, 1, 1, 2], [0], [0]>} : vector<2x8x8xf32>, vector<2x8x8xf32>, vector<2x8x8xf32> -> vector<2x8x8xf32>
    "tpu.trace_stop"() : () -> ()
    %62 = vector.extract_strided_slice %43 {offsets = [0, 0, 8], sizes = [2, 8, 8], strides = [1, 1, 1]} : vector<2x8x32xf32> to vector<2x8x8xf32>
    %63 = vector.extract_strided_slice %45 {offsets = [0, 0, 8], sizes = [2, 8, 8], strides = [1, 1, 1]} : vector<2x8x32xf32> to vector<2x8x8xf32>
    "tpu.trace_start"() <{level = 10 : i32, message = "bqd,bkd->bqk"}> : () -> ()
    %cst_24 = arith.constant dense<0.000000e+00> : vector<2x8x8xf32>
    %64 = tpu.matmul %62, %63, %cst_24 {dimension_numbers = #tpu.dot_dimension_numbers<[2], [2], [1], [1], [0, 0, 0, 1, 1, 1], [0], [0]>} : vector<2x8x8xf32>, vector<2x8x8xf32>, vector<2x8x8xf32> -> vector<2x8x8xf32>
    "tpu.trace_stop"() : () -> ()
    %cst_25 = arith.constant dense<0xFF800000> : vector<2x8xf32>
    %65 = vector.multi_reduction <maximumf>, %64, %cst_25 [2] : vector<2x8x8xf32> to vector<2x8xf32>
    %66 = vector.shape_cast %65 : vector<2x8xf32> to vector<2x8x1xf32>
    %67 = vector.broadcast %66 : vector<2x8x1xf32> to vector<2x8x8xf32>
    %68 = arith.subf %64, %67 : vector<2x8x8xf32>
    %69 = math.exp %68 : vector<2x8x8xf32>
    %cst_26 = arith.constant dense<0.000000e+00> : vector<2x8xf32>
    %70 = vector.multi_reduction <add>, %69, %cst_26 [2] : vector<2x8x8xf32> to vector<2x8xf32>
    %71 = vector.shape_cast %70 : vector<2x8xf32> to vector<2x8x1xf32>
    %72 = vector.broadcast %71 : vector<2x8x1xf32> to vector<2x8x8xf32>
    %73 = arith.divf %69, %72 : vector<2x8x8xf32>
    %74 = vector.extract_strided_slice %47 {offsets = [0, 0, 8], sizes = [2, 8, 8], strides = [1, 1, 1]} : vector<2x8x32xf32> to vector<2x8x8xf32>
    "tpu.trace_start"() <{level = 10 : i32, message = "bqk,bkd->bqd"}> : () -> ()
    %cst_27 = arith.constant dense<0.000000e+00> : vector<2x8x8xf32>
    %75 = tpu.matmul %73, %74, %cst_27 {dimension_numbers = #tpu.dot_dimension_numbers<[2], [1], [1], [2], [0, 0, 0, 1, 1, 2], [0], [0]>} : vector<2x8x8xf32>, vector<2x8x8xf32>, vector<2x8x8xf32> -> vector<2x8x8xf32>
    "tpu.trace_stop"() : () -> ()
    %76 = vector.extract_strided_slice %43 {offsets = [0, 0, 16], sizes = [2, 8, 8], strides = [1, 1, 1]} : vector<2x8x32xf32> to vector<2x8x8xf32>
    %77 = vector.extract_strided_slice %45 {offsets = [0, 0, 16], sizes = [2, 8, 8], strides = [1, 1, 1]} : vector<2x8x32xf32> to vector<2x8x8xf32>
    "tpu.trace_start"() <{level = 10 : i32, message = "bqd,bkd->bqk"}> : () -> ()
    %cst_28 = arith.constant dense<0.000000e+00> : vector<2x8x8xf32>
    %78 = tpu.matmul %76, %77, %cst_28 {dimension_numbers = #tpu.dot_dimension_numbers<[2], [2], [1], [1], [0, 0, 0, 1, 1, 1], [0], [0]>} : vector<2x8x8xf32>, vector<2x8x8xf32>, vector<2x8x8xf32> -> vector<2x8x8xf32>
    "tpu.trace_stop"() : () -> ()
    %cst_29 = arith.constant dense<0xFF800000> : vector<2x8xf32>
    %79 = vector.multi_reduction <maximumf>, %78, %cst_29 [2] : vector<2x8x8xf32> to vector<2x8xf32>
    %80 = vector.shape_cast %79 : vector<2x8xf32> to vector<2x8x1xf32>
    %81 = vector.broadcast %80 : vector<2x8x1xf32> to vector<2x8x8xf32>
    %82 = arith.subf %78, %81 : vector<2x8x8xf32>
    %83 = math.exp %82 : vector<2x8x8xf32>
    %cst_30 = arith.constant dense<0.000000e+00> : vector<2x8xf32>
    %84 = vector.multi_reduction <add>, %83, %cst_30 [2] : vector<2x8x8xf32> to vector<2x8xf32>
    %85 = vector.shape_cast %84 : vector<2x8xf32> to vector<2x8x1xf32>
    %86 = vector.broadcast %85 : vector<2x8x1xf32> to vector<2x8x8xf32>
    %87 = arith.divf %83, %86 : vector<2x8x8xf32>
    %88 = vector.extract_strided_slice %47 {offsets = [0, 0, 16], sizes = [2, 8, 8], strides = [1, 1, 1]} : vector<2x8x32xf32> to vector<2x8x8xf32>
    "tpu.trace_start"() <{level = 10 : i32, message = "bqk,bkd->bqd"}> : () -> ()
    %cst_31 = arith.constant dense<0.000000e+00> : vector<2x8x8xf32>
    %89 = tpu.matmul %87, %88, %cst_31 {dimension_numbers = #tpu.dot_dimension_numbers<[2], [1], [1], [2], [0, 0, 0, 1, 1, 2], [0], [0]>} : vector<2x8x8xf32>, vector<2x8x8xf32>, vector<2x8x8xf32> -> vector<2x8x8xf32>
    "tpu.trace_stop"() : () -> ()
    %90 = vector.extract_strided_slice %43 {offsets = [0, 0, 24], sizes = [2, 8, 8], strides = [1, 1, 1]} : vector<2x8x32xf32> to vector<2x8x8xf32>
    %91 = vector.extract_strided_slice %45 {offsets = [0, 0, 24], sizes = [2, 8, 8], strides = [1, 1, 1]} : vector<2x8x32xf32> to vector<2x8x8xf32>
    "tpu.trace_start"() <{level = 10 : i32, message = "bqd,bkd->bqk"}> : () -> ()
    %cst_32 = arith.constant dense<0.000000e+00> : vector<2x8x8xf32>
    %92 = tpu.matmul %90, %91, %cst_32 {dimension_numbers = #tpu.dot_dimension_numbers<[2], [2], [1], [1], [0, 0, 0, 1, 1, 1], [0], [0]>} : vector<2x8x8xf32>, vector<2x8x8xf32>, vector<2x8x8xf32> -> vector<2x8x8xf32>
    "tpu.trace_stop"() : () -> ()
    %cst_33 = arith.constant dense<0xFF800000> : vector<2x8xf32>
    %93 = vector.multi_reduction <maximumf>, %92, %cst_33 [2] : vector<2x8x8xf32> to vector<2x8xf32>
    %94 = vector.shape_cast %93 : vector<2x8xf32> to vector<2x8x1xf32>
    %95 = vector.broadcast %94 : vector<2x8x1xf32> to vector<2x8x8xf32>
    %96 = arith.subf %92, %95 : vector<2x8x8xf32>
    %97 = math.exp %96 : vector<2x8x8xf32>
    %cst_34 = arith.constant dense<0.000000e+00> : vector<2x8xf32>
    %98 = vector.multi_reduction <add>, %97, %cst_34 [2] : vector<2x8x8xf32> to vector<2x8xf32>
    %99 = vector.shape_cast %98 : vector<2x8xf32> to vector<2x8x1xf32>
    %100 = vector.broadcast %99 : vector<2x8x1xf32> to vector<2x8x8xf32>
    %101 = arith.divf %97, %100 : vector<2x8x8xf32>
    %102 = vector.extract_strided_slice %47 {offsets = [0, 0, 24], sizes = [2, 8, 8], strides = [1, 1, 1]} : vector<2x8x32xf32> to vector<2x8x8xf32>
    "tpu.trace_start"() <{level = 10 : i32, message = "bqk,bkd->bqd"}> : () -> ()
    %cst_35 = arith.constant dense<0.000000e+00> : vector<2x8x8xf32>
    %103 = tpu.matmul %101, %102, %cst_35 {dimension_numbers = #tpu.dot_dimension_numbers<[2], [1], [1], [2], [0, 0, 0, 1, 1, 2], [0], [0]>} : vector<2x8x8xf32>, vector<2x8x8xf32>, vector<2x8x8xf32> -> vector<2x8x8xf32>
    "tpu.trace_stop"() : () -> ()
    %104 = tpu.concatenate %61, %75, %89, %103 in 2 : vector<2x8x8xf32>, vector<2x8x8xf32>, vector<2x8x8xf32>, vector<2x8x8xf32> -> vector<2x8x32xf32>
    %105 = vector.shape_cast %104 : vector<2x8x32xf32> to vector<16x32xf32>
    %c0_36 = arith.constant 0 : index
    %c0_37 = arith.constant 0 : index
    %c0_38 = arith.constant 0 : index
    %106 = vector.load %arg7[%c0_36, %c0_37, %c0_38] : memref<1x32x32xf32, #tpu.memory_space<vmem>>, vector<1x32x32xf32>
    %107 = vector.shape_cast %106 : vector<1x32x32xf32> to vector<32x32xf32>
    %cst_39 = arith.constant dense<0.000000e+00> : vector<16x32xf32>
    %108 = tpu.matmul %105, %107, %cst_39 {dimension_numbers = #tpu.dot_dimension_numbers<[1], [0], [0], [1], [0, 0, 1, 1], [], []>} : vector<16x32xf32>, vector<32x32xf32>, vector<16x32xf32> -> vector<16x32xf32>
    %c0_40 = arith.constant 0 : index
    %c0_41 = arith.constant 0 : index
    %c0_42 = arith.constant 0 : index
    %109 = vector.load %arg8[%c0_40, %c0_41, %c0_42] : memref<1x1x32xf32, #tpu.memory_space<vmem>>, vector<1x1x32xf32>
    %110 = vector.shape_cast %109 : vector<1x1x32xf32> to vector<32xf32>
    %111 = vector.shape_cast %110 : vector<32xf32> to vector<1x32xf32>
    %112 = vector.broadcast %111 : vector<1x32xf32> to vector<16x32xf32>
    %113 = arith.addf %108, %112 : vector<16x32xf32>
    %114 = arith.addf %113, %3 : vector<16x32xf32>
    %c0_43 = arith.constant 0 : index
    %c0_44 = arith.constant 0 : index
    %c0_45 = arith.constant 0 : index
    %115 = vector.load %arg9[%c0_43, %c0_44, %c0_45] : memref<1x1x32xf32, #tpu.memory_space<vmem>>, vector<1x1x32xf32>
    %116 = vector.shape_cast %115 : vector<1x1x32xf32> to vector<32xf32>
    %c0_46 = arith.constant 0 : index
    %c0_47 = arith.constant 0 : index
    %c0_48 = arith.constant 0 : index
    %117 = vector.load %arg10[%c0_46, %c0_47, %c0_48] : memref<1x1x32xf32, #tpu.memory_space<vmem>>, vector<1x1x32xf32>
    %118 = vector.shape_cast %117 : vector<1x1x32xf32> to vector<32xf32>
    %cst_49 = arith.constant dense<0.000000e+00> : vector<16xf32>
    %119 = vector.multi_reduction <add>, %114, %cst_49 [1] : vector<16x32xf32> to vector<16xf32>
    %120 = vector.shape_cast %119 : vector<16xf32> to vector<16x1xf32>
    %cst_50 = arith.constant 3.200000e+01 : f32
    %121 = vector.broadcast %cst_50 : f32 to vector<16x1xf32>
    %122 = arith.divf %120, %121 : vector<16x1xf32>
    %123 = vector.broadcast %122 : vector<16x1xf32> to vector<16x32xf32>
    %124 = arith.subf %114, %123 : vector<16x32xf32>
    %125 = arith.mulf %124, %124 : vector<16x32xf32>
    %cst_51 = arith.constant dense<0.000000e+00> : vector<16xf32>
    %126 = vector.multi_reduction <add>, %125, %cst_51 [1] : vector<16x32xf32> to vector<16xf32>
    %127 = vector.shape_cast %126 : vector<16xf32> to vector<16x1xf32>
    %cst_52 = arith.constant 3.200000e+01 : f32
    %128 = vector.broadcast %cst_52 : f32 to vector<16x1xf32>
    %129 = arith.divf %127, %128 : vector<16x1xf32>
    %130 = vector.broadcast %122 : vector<16x1xf32> to vector<16x32xf32>
    %131 = arith.subf %114, %130 : vector<16x32xf32>
    %cst_53 = arith.constant 9.99999974E-6 : f32
    %132 = vector.broadcast %cst_53 : f32 to vector<16x1xf32>
    %133 = arith.addf %129, %132 : vector<16x1xf32>
    %134 = math.rsqrt %133 : vector<16x1xf32>
    %135 = vector.broadcast %134 : vector<16x1xf32> to vector<16x32xf32>
    %136 = arith.mulf %131, %135 : vector<16x32xf32>
    %137 = vector.shape_cast %116 : vector<32xf32> to vector<1x32xf32>
    %138 = vector.broadcast %137 : vector<1x32xf32> to vector<16x32xf32>
    %139 = arith.mulf %136, %138 : vector<16x32xf32>
    %140 = vector.shape_cast %118 : vector<32xf32> to vector<1x32xf32>
    %141 = vector.broadcast %140 : vector<1x32xf32> to vector<16x32xf32>
    %142 = arith.addf %139, %141 : vector<16x32xf32>
    %c0_54 = arith.constant 0 : index
    %c0_55 = arith.constant 0 : index
    %c0_56 = arith.constant 0 : index
    %143 = vector.load %arg11[%c0_54, %c0_55, %c0_56] : memref<1x32x128xf32, #tpu.memory_space<vmem>>, vector<1x32x128xf32>
    %144 = vector.shape_cast %143 : vector<1x32x128xf32> to vector<32x128xf32>
    %cst_57 = arith.constant dense<0.000000e+00> : vector<16x128xf32>
    %145 = tpu.matmul %142, %144, %cst_57 {dimension_numbers = #tpu.dot_dimension_numbers<[1], [0], [0], [1], [0, 0, 1, 1], [], []>} : vector<16x32xf32>, vector<32x128xf32>, vector<16x128xf32> -> vector<16x128xf32>
    %c0_58 = arith.constant 0 : index
    %c0_59 = arith.constant 0 : index
    %c0_60 = arith.constant 0 : index
    %146 = vector.load %arg12[%c0_58, %c0_59, %c0_60] : memref<1x1x128xf32, #tpu.memory_space<vmem>>, vector<1x1x128xf32>
    %147 = vector.shape_cast %146 : vector<1x1x128xf32> to vector<128xf32>
    %148 = vector.shape_cast %147 : vector<128xf32> to vector<1x128xf32>
    %149 = vector.broadcast %148 : vector<1x128xf32> to vector<16x128xf32>
    %150 = arith.addf %145, %149 : vector<16x128xf32>
    %151 = arith.mulf %150, %150 : vector<16x128xf32>
    %152 = arith.mulf %150, %151 : vector<16x128xf32>
    %cst_61 = arith.constant 4.471500e-02 : f32
    %153 = vector.broadcast %cst_61 : f32 to vector<16x128xf32>
    %154 = arith.mulf %153, %152 : vector<16x128xf32>
    %155 = arith.addf %150, %154 : vector<16x128xf32>
    %cst_62 = arith.constant 0.797884583 : f32
    %156 = vector.broadcast %cst_62 : f32 to vector<16x128xf32>
    %157 = arith.mulf %156, %155 : vector<16x128xf32>
    %158 = math.tanh %157 : vector<16x128xf32>
    %cst_63 = arith.constant 1.000000e+00 : f32
    %159 = vector.broadcast %cst_63 : f32 to vector<16x128xf32>
    %160 = arith.addf %159, %158 : vector<16x128xf32>
    %cst_64 = arith.constant 5.000000e-01 : f32
    %161 = vector.broadcast %cst_64 : f32 to vector<16x128xf32>
    %162 = arith.mulf %161, %160 : vector<16x128xf32>
    %163 = arith.mulf %150, %162 : vector<16x128xf32>
    %c0_65 = arith.constant 0 : index
    %c0_66 = arith.constant 0 : index
    %c0_67 = arith.constant 0 : index
    %164 = vector.load %arg13[%c0_65, %c0_66, %c0_67] : memref<1x128x32xf32, #tpu.memory_space<vmem>>, vector<1x128x32xf32>
    %165 = vector.shape_cast %164 : vector<1x128x32xf32> to vector<128x32xf32>
    %cst_68 = arith.constant dense<0.000000e+00> : vector<16x32xf32>
    %166 = tpu.matmul %163, %165, %cst_68 {dimension_numbers = #tpu.dot_dimension_numbers<[1], [0], [0], [1], [0, 0, 1, 1], [], []>} : vector<16x128xf32>, vector<128x32xf32>, vector<16x32xf32> -> vector<16x32xf32>
    %c0_69 = arith.constant 0 : index
    %c0_70 = arith.constant 0 : index
    %c0_71 = arith.constant 0 : index
    %167 = vector.load %arg14[%c0_69, %c0_70, %c0_71] : memref<1x1x32xf32, #tpu.memory_space<vmem>>, vector<1x1x32xf32>
    %168 = vector.shape_cast %167 : vector<1x1x32xf32> to vector<32xf32>
    %169 = vector.shape_cast %168 : vector<32xf32> to vector<1x32xf32>
    %170 = vector.broadcast %169 : vector<1x32xf32> to vector<16x32xf32>
    %171 = arith.addf %166, %170 : vector<16x32xf32>
    %172 = arith.addf %171, %114 : vector<16x32xf32>
    %c0_72 = arith.constant 0 : index
    %c0_73 = arith.constant 0 : index
    %173 = vector.load %arg19[%c0_72, %c0_73] : memref<16x32xf32, #tpu.memory_space<vmem>>, vector<16x32xf32>
    tpu.vector_store %arg19[%c0_72, %c0_73], %172 {strides = array<i32>} : memref<16x32xf32, #tpu.memory_space<vmem>>, vector<16x32xf32>,
    %c1_i32 = arith.constant 1 : i32
    %174 = arith.cmpi eq, %arg0, %c1_i32 : i32
    %175 = arith.extui %174 : i1 to i32
    %c0_i32_74 = arith.constant 0 : i32
    %176 = arith.cmpi ne, %175, %c0_i32_74 : i32
    scf.if %176 {
      %c0_75 = arith.constant 0 : index
      %c0_76 = arith.constant 0 : index
      %177 = vector.load %arg15[%c0_75, %c0_76] : memref<1x32xf32, #tpu.memory_space<vmem>>, vector<1x32xf32>
      %178 = vector.shape_cast %177 : vector<1x32xf32> to vector<32xf32>
      %179 = vector.shape_cast %172 : vector<16x32xf32> to vector<2x8x32xf32>
      %180 = vector.shape_cast %178 : vector<32xf32> to vector<1x1x32xf32>
      %181 = vector.broadcast %180 : vector<1x1x32xf32> to vector<2x8x32xf32>
      %182 = arith.mulf %179, %181 : vector<2x8x32xf32>
      %cst_77 = arith.constant dense<0.000000e+00> : vector<2x8xf32>
      %183 = vector.multi_reduction <add>, %182, %cst_77 [2] : vector<2x8x32xf32> to vector<2x8xf32>
      %c0_78 = arith.constant 0 : index
      %c0_79 = arith.constant 0 : index
      %184 = vector.load %arg16[%c0_78, %c0_79] : memref<1x1xf32, #tpu.memory_space<vmem>>, vector<1x1xf32>
      %185 = vector.extract %184[0, 0] : f32 from vector<1x1xf32>
      %186 = vector.broadcast %185 : f32 to vector<2x8xf32>
      %187 = arith.addf %183, %186 : vector<2x8xf32>
      %c0_80 = arith.constant 0 : index
      %c0_81 = arith.constant 0 : index
      %188 = vector.load %arg17[%c0_80, %c0_81] : memref<2x8xf32, #tpu.memory_space<vmem>>, vector<2x8xf32>
      tpu.vector_store %arg17[%c0_80, %c0_81], %187 {strides = array<i32>} : memref<2x8xf32, #tpu.memory_space<vmem>>, vector<2x8xf32>,
      %189 = tpu.iota {dimensions = array<i32: 1>} : vector<2x8xi32>
      %c1_i32_82 = arith.constant 1 : i32
      %190 = vector.broadcast %c1_i32_82 : i32 to vector<2x8xi32>
      %191 = arith.cmpi sge, %189, %190 : vector<2x8xi32>
      %cst_83 = arith.constant -1.000000e+30 : f32
      %192 = vector.broadcast %cst_83 : f32 to vector<2x8xf32>
      %193 = arith.select %191, %187, %192 : vector<2x8xi1>, vector<2x8xf32>
      %cst_84 = arith.constant dense<0xFF800000> : vector<2xf32>
      %194 = vector.multi_reduction <maximumf>, %193, %cst_84 [1] : vector<2x8xf32> to vector<2xf32>
      %195 = vector.shape_cast %194 : vector<2xf32> to vector<2x1xf32>
      %196 = vector.broadcast %195 : vector<2x1xf32> to vector<2x8xf32>
      %197 = arith.subf %193, %196 : vector<2x8xf32>
      %198 = math.exp %197 : vector<2x8xf32>
      %cst_85 = arith.constant 0.000000e+00 : f32
      %199 = vector.broadcast %cst_85 : f32 to vector<2x8xf32>
      %200 = arith.select %191, %198, %199 : vector<2x8xi1>, vector<2x8xf32>
      %cst_86 = arith.constant dense<0.000000e+00> : vector<2xf32>
      %201 = vector.multi_reduction <add>, %200, %cst_86 [1] : vector<2x8xf32> to vector<2xf32>
      %202 = vector.shape_cast %201 : vector<2xf32> to vector<2x1xf32>
      %203 = math.log %202 : vector<2x1xf32>
      %204 = arith.addf %195, %203 : vector<2x1xf32>
      %c0_87 = arith.constant 0 : index
      %c0_88 = arith.constant 0 : index
      %205 = vector.load %arg2[%c0_87, %c0_88] : memref<2x1xi32, #tpu.memory_space<vmem>>, vector<2x1xi32>
      %c0_i32_89 = arith.constant 0 : i32
      %c6_i32 = arith.constant 6 : i32
      %206 = vector.broadcast %c0_i32_89 : i32 to vector<2x1xi32>
      %207 = arith.maxsi %206, %205 : vector<2x1xi32>
      %208 = vector.broadcast %c6_i32 : i32 to vector<2x1xi32>
      %209 = arith.minsi %208, %207 : vector<2x1xi32>
      %c1_i32_90 = arith.constant 1 : i32
      %210 = vector.broadcast %c1_i32_90 : i32 to vector<2x1xi32>
      %211 = arith.addi %209, %210 : vector<2x1xi32>
      %212 = vector.broadcast %211 : vector<2x1xi32> to vector<2x8xi32>
      %213 = arith.cmpi eq, %189, %212 : vector<2x8xi32>
      %cst_91 = arith.constant 0.000000e+00 : f32
      %214 = vector.broadcast %cst_91 : f32 to vector<2x8xf32>
      %215 = arith.select %213, %187, %214 : vector<2x8xi1>, vector<2x8xf32>
      %cst_92 = arith.constant dense<0.000000e+00> : vector<2xf32>
      %216 = vector.multi_reduction <add>, %215, %cst_92 [1] : vector<2x8xf32> to vector<2xf32>
      %217 = vector.shape_cast %216 : vector<2xf32> to vector<2x1xf32>
      %218 = arith.subf %204, %217 : vector<2x1xf32>
      %cst_93 = arith.constant dense<0.000000e+00> : vector<1xf32>
      %219 = vector.multi_reduction <add>, %218, %cst_93 [0] : vector<2x1xf32> to vector<1xf32>
      %220 = vector.shape_cast %219 : vector<1xf32> to vector<1x1xf32>
      %cst_94 = arith.constant 5.000000e-01 : f32
      %221 = vector.broadcast %cst_94 : f32 to vector<1x1xf32>
      %222 = arith.mulf %220, %221 : vector<1x1xf32>
      %c0_95 = arith.constant 0 : index
      %c0_96 = arith.constant 0 : index
      %223 = vector.load %arg18[%c0_95, %c0_96] : memref<1x1xf32, #tpu.memory_space<vmem>>, vector<1x1xf32>
      tpu.vector_store %arg18[%c0_95, %c0_96], %222 {strides = array<i32>} : memref<1x1xf32, #tpu.memory_space<vmem>>, vector<1x1xf32>,
    } else {
    }
    return
  }
  func.func @transform_0(%arg0: i32) -> (i32, i32, i32) {
    %c0_i32 = arith.constant 0 : i32
    %c0_i32_0 = arith.constant 0 : i32
    %c0_i32_1 = arith.constant 0 : i32
    %c0_i32_2 = arith.constant 0 : i32
    return %c0_i32, %c0_i32_0, %c0_i32_1 : i32, i32, i32
  }
  func.func @transform_1(%arg0: i32) -> (i32, i32) {
    %c0_i32 = arith.constant 0 : i32
    %c0_i32_0 = arith.constant 0 : i32
    %c0_i32_1 = arith.constant 0 : i32
    return %c0_i32, %c0_i32_0 : i32, i32
  }
  func.func @transform_2(%arg0: i32) -> (i32, i32, i32) {
    %c0_i32 = arith.constant 0 : i32
    %c0_i32_0 = arith.constant 0 : i32
    %c0_i32_1 = arith.constant 0 : i32
    return %arg0, %c0_i32, %c0_i32_0 : i32, i32, i32
  }
  func.func @transform_3(%arg0: i32) -> (i32, i32, i32) {
    %c0_i32 = arith.constant 0 : i32
    %c0_i32_0 = arith.constant 0 : i32
    %c0_i32_1 = arith.constant 0 : i32
    return %arg0, %c0_i32, %c0_i32_0 : i32, i32, i32
  }
  func.func @transform_4(%arg0: i32) -> (i32, i32, i32) {
    %c0_i32 = arith.constant 0 : i32
    %c0_i32_0 = arith.constant 0 : i32
    %c0_i32_1 = arith.constant 0 : i32
    return %arg0, %c0_i32, %c0_i32_0 : i32, i32, i32
  }
  func.func @transform_5(%arg0: i32) -> (i32, i32, i32) {
    %c0_i32 = arith.constant 0 : i32
    %c0_i32_0 = arith.constant 0 : i32
    %c0_i32_1 = arith.constant 0 : i32
    return %arg0, %c0_i32, %c0_i32_0 : i32, i32, i32
  }
  func.func @transform_6(%arg0: i32) -> (i32, i32, i32) {
    %c0_i32 = arith.constant 0 : i32
    %c0_i32_0 = arith.constant 0 : i32
    %c0_i32_1 = arith.constant 0 : i32
    return %arg0, %c0_i32, %c0_i32_0 : i32, i32, i32
  }
  func.func @transform_7(%arg0: i32) -> (i32, i32, i32) {
    %c0_i32 = arith.constant 0 : i32
    %c0_i32_0 = arith.constant 0 : i32
    %c0_i32_1 = arith.constant 0 : i32
    return %arg0, %c0_i32, %c0_i32_0 : i32, i32, i32
  }
  func.func @transform_8(%arg0: i32) -> (i32, i32, i32) {
    %c0_i32 = arith.constant 0 : i32
    %c0_i32_0 = arith.constant 0 : i32
    %c0_i32_1 = arith.constant 0 : i32
    return %arg0, %c0_i32, %c0_i32_0 : i32, i32, i32
  }
  func.func @transform_9(%arg0: i32) -> (i32, i32, i32) {
    %c0_i32 = arith.constant 0 : i32
    %c0_i32_0 = arith.constant 0 : i32
    %c0_i32_1 = arith.constant 0 : i32
    return %arg0, %c0_i32, %c0_i32_0 : i32, i32, i32
  }
  func.func @transform_10(%arg0: i32) -> (i32, i32, i32) {
    %c0_i32 = arith.constant 0 : i32
    %c0_i32_0 = arith.constant 0 : i32
    %c0_i32_1 = arith.constant 0 : i32
    return %arg0, %c0_i32, %c0_i32_0 : i32, i32, i32
  }
  func.func @transform_11(%arg0: i32) -> (i32, i32, i32) {
    %c0_i32 = arith.constant 0 : i32
    %c0_i32_0 = arith.constant 0 : i32
    %c0_i32_1 = arith.constant 0 : i32
    return %arg0, %c0_i32, %c0_i32_0 : i32, i32, i32
  }
  func.func @transform_12(%arg0: i32) -> (i32, i32, i32) {
    %c0_i32 = arith.constant 0 : i32
    %c0_i32_0 = arith.constant 0 : i32
    %c0_i32_1 = arith.constant 0 : i32
    return %arg0, %c0_i32, %c0_i32_0 : i32, i32, i32
  }
  func.func @transform_13(%arg0: i32) -> (i32, i32, i32) {
    %c0_i32 = arith.constant 0 : i32
    %c0_i32_0 = arith.constant 0 : i32
    %c0_i32_1 = arith.constant 0 : i32
    return %arg0, %c0_i32, %c0_i32_0 : i32, i32, i32
  }
  func.func @transform_14(%arg0: i32) -> (i32, i32) {
    %c0_i32 = arith.constant 0 : i32
    %c0_i32_0 = arith.constant 0 : i32
    %c0_i32_1 = arith.constant 0 : i32
    return %c0_i32, %c0_i32_0 : i32, i32
  }
  func.func @transform_15(%arg0: i32) -> (i32, i32) {
    %c0_i32 = arith.constant 0 : i32
    %c0_i32_0 = arith.constant 0 : i32
    %c0_i32_1 = arith.constant 0 : i32
    return %c0_i32, %c0_i32_0 : i32, i32
  }
  func.func @transform_16(%arg0: i32) -> (i32, i32) {
    %c0_i32 = arith.constant 0 : i32
    %c0_i32_0 = arith.constant 0 : i32
    %c0_i32_1 = arith.constant 0 : i32
    return %c0_i32, %c0_i32_0 : i32, i32
  }
  func.func @transform_17(%arg0: i32) -> (i32, i32) {
    %c0_i32 = arith.constant 0 : i32
    %c0_i32_0 = arith.constant 0 : i32
    %c0_i32_1 = arith.constant 0 : i32
    return %c0_i32, %c0_i32_0 : i32, i32
  }
}

</mosaic_0001>

<bundles_post_ra>
// kernel: retrieval_transformer_forward.1
= control target key start
LH: loop header
LB: loop body
LE: loop exit
PB: predicated region body
PF: predicated region fallthrough
CT: control target
= control target key end

     0   :  { %s3810_s0 = inlined_call_operand.vmem [shape: f32[2,8,32], index: 0, kind: input, shape index: {}]   ;;  %s3811_s1 = inlined_call_operand.vmem [shape: s32[2,1], index: 1, kind: input, shape index: {}]   ;;  %s3812_s2 = inlined_call_operand.vmem [shape: f32[2,1,32], index: 2, kind: input, shape index: {}]   ;;  %s3813_s3 = inlined_call_operand.vmem [shape: f32[2,1,32], index: 3, kind: input, shape index: {}]   ;;  %s3814_s4 = inlined_call_operand.vmem [shape: f32[2,32,96], index: 4, kind: input, shape index: {}]   ;;  %s3815_s5 = inlined_call_operand.vmem [shape: f32[2,1,96], index: 5, kind: input, shape index: {}]   ;;  %s3816_s6 = inlined_call_operand.vmem [shape: f32[2,32,32], index: 6, kind: input, shape index: {}]   ;;  %s3817_s7 = inlined_call_operand.vmem [shape: f32[2,1,32], index: 7, kind: input, shape index: {}]   ;;  %s3818_s8 = inlined_call_operand.vmem [shape: f32[2,1,32], index: 8, kind: input, shape index: {}]   ;;  %s3819_s9 = inlined_call_operand.vmem [shape: f32[2,1,32], index: 9, kind: input, shape index: {}]   ;;  %s3820_s10 = inlined_call_operand.vmem [shape: f32[2,32,128], index: 10, kind: input, shape index: {}]   ;;  %s3821_s11 = inlined_call_operand.vmem [shape: f32[2,1,128], index: 11, kind: input, shape index: {}]   ;;  %s3822_s12 = inlined_call_operand.vmem [shape: f32[2,128,32], index: 12, kind: input, shape index: {}]   ;;  %s3823_s13 = inlined_call_operand.vmem [shape: f32[2,1,32], index: 13, kind: input, shape index: {}]   ;;  %s3824_s14 = inlined_call_operand.vmem [shape: f32[1,32], index: 14, kind: input, shape index: {}]   ;;  %s3825_s15 = inlined_call_operand.<no memory space> [shape: f32[1,1], index: 15, kind: input, shape index: {}]   ;;  %s3826_s16 = inlined_call_operand.hbm [shape: f32[2,8], index: 16, kind: output, shape index: {0}]   ;;  %s3827_s17 = inlined_call_operand.hbm [shape: f32[1,1], index: 17, kind: output, shape index: {1}]  }
   0x1   :  { %3832 = sst [smem:[#allocation11_spill]] %s3810_s0  ;;  %v23_v0 = vstv %s3825_s15 }
   0x2   :  { %3833 = sst [smem:[#allocation12_spill]] %s3811_s1  ;;  %24 = vst [vmem:[#allocation3] sm:$0x1] %v23_v0 }
   0x3   :  { %3834 = sst [smem:[#allocation13_spill]] %s3814_s4 }
   0x4   :  { %3835 = sst [smem:[#allocation14_spill]] %s3816_s6 }
   0x5   :  { %3836 = sst [smem:[#allocation15_spill]] %s3824_s14 }
   0x6   :  { %3837 = sst [smem:[#allocation16_spill]] %s3826_s16 }
   0x7   :  { %3838 = sst [smem:[#allocation17_spill]] %s3827_s17 }
   0x8   :  { %25 = vsyncpa [#allocation5], 0 }
   0x9   :  { %26 = vsyncpa [#allocation7], 0  ;;  %s3432_s26 = smov 0  }
   0xa LB: > { %3839 = sst [smem:[#allocation10_spill]] %s3317_s26  ;;  %s3438_s27 = sadd.s32 4294967295, %s3317_s26   ;;  %s3317_s26 = sphi %s3432_s26, %s32_s26  }
   0xb   : > { %p2827_p0 = scmp.ge.s32.totalorder %s3317_s26, 1  ;;  %p578_p1 = scmp.lt.s32.totalorder %s3317_s26, 3 }
   0xd   : > { %p579_p2 = pnand %p2827_p0, %p578_p1 }
   0xe   : > { %p664_p3 = scmp.lt.s32.totalorder (!%p579_p2), %s3438_s27, 1  ;;  %s3840_s4 = sld [smem:[#allocation13_spill]] (!%p579_p2) }
   0xf   : > { %582 = sbr.rel (%p579_p2) target bundleno = 4680 (0x1248), region = 84  ;;  %s3841_s6 = sld [smem:[#allocation14_spill]] (!%p579_p2) }
  0x10   : > { %p2836_p4 = scmp.ne.s32.totalorder (!%p579_p2), %s3438_s27, 0 }
  0x16   : > { %s3444_s15 = scalar_select %p664_p3, %s3438_s27, 1 }
  0x17   : > { %711 = sbr.rel (%p2836_p4) target bundleno = 31 (0x1f), region = 88  ;;  %s3842_s23 = sld [smem:[#allocation11_spill]] (!%p2836_p4)  ;;  %vm714_vm0 = vcmask (!%p2836_p4), 261120   ;;  %vm717_vm1 = vcmask (!%p2836_p4), 58368   ;;  %vm719_vm2 = vcmask (!%p2836_p4), 0   ;;  %v3319_v3 = vmov (!%p2836_p4), 0.0  }
  0x18   : > { %s2883_s1 = sshll.u32 %s3444_s15, 5  ;;  %s688_s16 = scalar_lea.vmem %s3818_s8, %s3444_s15  ;;  %718 = vst.msk [vmem:[#allocation4] sm:$0x3] (!%p2836_p4), %vm717_vm1, %v3319_v3 }
  0x19   : > { %s3462_s25 = scalar_lea.vmem %s3840_s4, %s2883_s1  ;;  %s3467_s26 = scalar_lea.vmem %s3841_s6, %s2883_s1  ;;  %720 = vst.msk [vmem:[#allocation6] sm:$0x1] (!%p2836_p4), %vm719_vm2, %v3319_v3 }
  0x1a   : > { %s691_s22 = scalar_lea.vmem %s3819_s9, %s3444_s15  ;;  %s3484_s4 = scalar_lea.vmem %s3820_s10, %s2883_s1 }
  0x1b   : > { %s699_s6 = scalar_lea.vmem %s3821_s11, %s3444_s15  ;;  %s2886_s14 = sshll.u32 %s3444_s15, 7 }
  0x1c   : > { %s3494_s30 = scalar_lea.vmem %s3822_s12, %s2886_s14  ;;  %s707_s20 = scalar_lea.vmem %s3823_s13, %s3444_s15 }
  0x1d   : > { %v712_v1 = vld [vmem:[%s3842_s23] sm:$0xff] (!%p2836_p4)  ;;  %v713_v2 = vld [vmem:[%s3842_s23 + $0x8] sm:$0xff] (!%p2836_p4) }
  0x1e   : > { %715 = vst.msk [vmem:[#allocation2] sm:$0xff] %vm714_vm0, %v712_v1  ;;  %716 = vst.msk [vmem:[#allocation2 + $0x8] sm:$0xff] %vm714_vm0, %v713_v2 }
  0x1f PF: > { %vm725_vm3 = vcmask 261120   ;;  %v769_v18 = vld [vmem:[%s3462_s25] sm:$0xff]  ;;  %v770_v19 = vld [vmem:[%s3462_s25 + $0x8] sm:$0xff]  ;;  %v771_v20 = vld [vmem:[%s3462_s25 + $0x10] sm:$0xff]  ;;  %s3843_s17 = scalar_lea.vmem %s3812_s2, %s3444_s15  ;;  %s3844_s19 = scalar_lea.vmem %s3813_s3, %s3444_s15  ;;  %v3320_v40 = vmov 0.0   ;;  %vm3321_vm4 = vmmov 0  }
  0x20   : > { %v3103_v21 = vpack.c.bf16 %v770_v19, %v769_v18  ;;  %v772_v22 = vld [vmem:[%s3462_s25 + $0x18] sm:$0xff]  ;;  %v2837_v31 = vld [vmem:[%s3843_s17] ss:$0 sm:$0xff]  ;;  %2976 = vmatprep.subr.mxu0 %v3320_v40  ;;  %2978 = vmatprep.mubr.msk.f32.mxu0 %vm3321_vm4, %v3320_v40  ;;  %s3845_s1 = scalar_lea.vmem %s3815_s5, %s3444_s15  ;;  %s3322_s24 = smov 96   ;;  %vm866_vm5 = vcmask 64512   ;;  %vm2213_vm6 = vcmask 195584  }
  0x21   : > { %v3107_v23 = vpack.c.bf16 %v772_v22, %v771_v20  ;;  %v2838_v33 = vld [vmem:[%s3844_s19] ss:$0 sm:$0xff]  ;;  %s3323_s28 = smov 64   ;;  %s3324_s14 = smov 88   ;;  %vm2210_vm7 = vcmask 130048  }
  0x22   : > { %3104 = vmatprep.subr.bf16.mxu1 %v3103_v21  ;;  %v2839_v41 = vld [vmem:[%s3845_s1] ss:$0 sm:$0xff]  ;;  %s3325_s29 = smov 120   ;;  %s3326_s17 = smov 56  }
  0x23   : > { %3106 = vmatpush3.bf16.msra.mxu1 %v3103_v21  ;;  %s3327_s25 = smov 80   ;;  %s3328_s0 = smov 112  }
  0x24   : > { %3108 = vmatprep.subr.bf16.mxu1 %v3107_v23  ;;  %s3329_s19 = smov 48   ;;  %s3330_s18 = smov 72  }
  0x25   : > { %v3507_v4 = vld [vmem:[#allocation2] sm:$0xff]  ;;  %v3509_v5 = vld [vmem:[#allocation2 + $0x8] sm:$0xff]  ;;  %s3331_s21 = smov 104   ;;  %s3332_s1 = smov 40  }
  0x26   : > { %v726_v6 = vsel %vm725_vm3, %v3507_v4, 0.0  ;;  %v729_v7 = vsel %vm725_vm3, %v3509_v5, 0.0  ;;  %p2875_p5 = scmp.ne.s32.totalorder %s3438_s27, 1 }
  0x27   : > { %727 = vadd.xlane.f32.xlu0 %v726_v6  ;;  %3110 = vmatpush3.bf16.msra.mxu1 %v3107_v23  ;;  %vm2602_vm8 = vcmask (!%p2875_p5), 1041409   ;;  %vm2605_vm9 = vcmask (!%p2875_p5), 58368   ;;  %vm2637_vm14 = vcmask (!%p2875_p5), 1041408   ;;  %vm2646_vm15 = vcmask (!%p2875_p5), 0  }
  0x28   : > { %2966 = vmatprep.subr.mxu1 %v3320_v40 }
  0x2b   : > { %730 = vadd.xlane.f32.xlu0 %v729_v7 }
  0xb4   : > { %v728_v8 = vpop.xlane.xlu0 %727 }
  0xb5   : > { %v733_v9 = vmul.f32 0.03125, %v728_v8 }
  0xb7   : > { %v735_v10 = vsub.f32 %v3507_v4, %v733_v9 }
  0xb8   : > { %v731_v11 = vpop.xlane.xlu0 %730 }
  0xb9   : > { %v734_v12 = vmul.f32 0.03125, %v731_v11  ;;  %v737_v13 = vmul.f32 %v735_v10, %v735_v10 }
  0xbb   : > { %v736_v14 = vsub.f32 %v3509_v5, %v734_v12  ;;  %v739_v15 = vsel %vm725_vm3, %v737_v13, 0.0 }
  0xbc   : > { %740 = vadd.xlane.f32.xlu1 %v739_v15 }
  0xbd   : > { %v738_v16 = vmul.f32 %v736_v14, %v736_v14 }
  0xbf   : > { %v742_v17 = vsel %vm725_vm3, %v738_v16, 0.0 }
  0xc0   : > { %743 = vadd.xlane.f32.xlu1 %v742_v17 }
 0x149   : > { %v741_v24 = vpop.xlane.xlu1 %740 }
 0x14a   : > { %v745_v25 = vmul.f32 0.03125, %v741_v24 }
 0x14c   : > { %v747_v26 = vadd.f32 1e-05, %v745_v25 }
 0x14d   : > { %v744_v27 = vpop.xlane.xlu1 %743 }
 0x14e   : > { %3201 = vrsqrt.f32 %v747_v26  ;;  %v746_v28 = vmul.f32 0.03125, %v744_v27 }
 0x150   : > { %v748_v29 = vadd.f32 1e-05, %v746_v28 }
 0x152   : > { %3203 = vrsqrt.f32 %v748_v29 }
 0x158   : > { %v3202_v30 = vpop.eup %3201 }
 0x159   : > { %v751_v32 = vmul.f32 %v3202_v30, %v735_v10 }
 0x15b   : > { %v759_v34 = vmul.f32 %v2837_v31, %v751_v32 }
 0x15c   : > { %v3204_v35 = vpop.eup %3203 }
 0x15d   : > { %v752_v36 = vmul.f32 %v3204_v35, %v736_v14  ;;  %v767_v37 = vadd.f32 %v2838_v33, %v759_v34 }
 0x15f   : > { %v760_v38 = vmul.f32 %v2837_v31, %v752_v36  ;;  %2963 = vmatprep.mubr.msk.f32.mxu1 %vm725_vm3, %v767_v37 }
 0x161   : > { %v768_v39 = vadd.f32 %v2838_v33, %v760_v38 }
 0x163   : > { %2964 = vmatmul.mubr.msk.f32.vlgmr.msra.gmra.mrb[0].mxu1 %vm725_vm3, %v768_v39 }
 0x164   : > { %2968 = vmatprep.mubr.msk.f32.mxu1 %vm3321_vm4, %v3320_v40 }
 0x236   : > { %v2965_v42 = vpop.f32.mrb[0].mxu1 }
 0x237   : > { %v3546_v43 = vadd.f32 %v2965_v42, %v2839_v41  ;;  %v852_v44 = vpop.f32.mrb[1].mxu1 }
 0x238   : > { %v3548_v45 = vadd.f32 %v2839_v41, %v852_v44 }
 0x239   : > { %943 = vrot.lane.b32.xlu1 %v3546_v43, %s3322_s24  ;;  %v3563_v49 = vmul.f32 0.35355338, %v3546_v43 }
 0x23a   : > { %864 = vrot.lane.b32.xlu0 %v3548_v45, %s3322_s24  ;;  %v3554_v47 = vmul.f32 0.35355338, %v3548_v45  ;;  %s3333_s24 = smov 8  }
 0x2ab   : > { %v944_v48 = vpop.permute.xlu1 %943 }
 0x2ac   : > { %v865_v46 = vpop.permute.xlu0 %864 }
 0x2ad   : > { %2967 = vmatpush3.xpose.msk.msra.mxu1 %vm866_vm5, %v865_v46 }
 0x2ae   : > { %2971 = vmatprep.subr.mxu1 %v3320_v40 }
 0x2b0   : > { %2969 = vmatmul.mubr.msk.f32.vlgmr.msra.gmra.mrb[2].mxu1 %vm866_vm5, %v3554_v47 }
 0x2b1   : > { %2972 = vmatpush3.xpose.msk.msra.mxu1 %vm866_vm5, %v944_v48  ;;  %2973 = vmatprep.mubr.msk.f32.mxu1 %vm3321_vm4, %v3320_v40 }
 0x2b2   : > { %2981 = vmatprep.subr.mxu1 %v3320_v40 }
 0x2b4   : > { %2974 = vmatmul.mubr.msk.f32.vlgmr.msra.gmra.mrb[4].mxu1 %vm866_vm5, %v3563_v49 }
 0x2b5   : > { %2983 = vmatprep.mubr.msk.f32.mxu1 %vm3321_vm4, %v3320_v40 }
 0x383   : > { %v938_v50 = vpop.f32.mrb[2].mxu1 }
 0x384   : > { %v2970_v51 = vpop.f32.mrb[3].mxu1  ;;  %v1020_v52 = vsel %vm866_vm5, %v938_v50, -inf }
 0x385   : > { %1021 = vmax.xlane.f32.xlu1 %v1020_v52 }
 0x387   : > { %v1016_v53 = vpop.f32.mrb[4].mxu1 }
 0x388   : > { %v2975_v54 = vpop.f32.mrb[5].mxu1  ;;  %v1023_v55 = vsel %vm866_vm5, %v1016_v53, -inf }
 0x389   : > { %1024 = vmax.xlane.f32.xlu0 %v1023_v55 }
 0x396   : > { %1118 = vrot.lane.b32.xlu1 %v3546_v43, %s3323_s28 }
 0x39a   : > { %1196 = vrot.lane.b32.xlu1 %v3548_v45, %s3324_s14 }
 0x39e   : > { %1274 = vrot.lane.b32.xlu1 %v3546_v43, %s3324_s14  ;;  %s3335_s14 = smov 24  }
 0x39f   : > { %1042 = vrot.lane.b32.xlu0 %v3548_v45, %s3323_s28  ;;  %s3334_s28 = smov 16  }
 0x412   : > { %v1022_v56 = vpop.xlane.xlu1 %1021 }
 0x413   : > { %v1026_v57 = vsub.f32 %v938_v50, %v1022_v56 }
 0x415   : > { %v1028_v58 = vmul.f32 1.442695, %v1026_v57 }
 0x416   : > { %v1119_v59 = vpop.permute.xlu1 %1118  ;;  %v1025_v60 = vpop.xlane.xlu0 %1024 }
 0x417   : > { %3205 = vpow2.f32 %v1028_v58  ;;  %v1027_v61 = vsub.f32 %v1016_v53, %v1025_v60  ;;  %2982 = vmatpush3.msra.mxu1 %v1119_v59 }
 0x418   : > { %2991 = vmatprep.subr.mxu1 %v3320_v40 }
 0x419   : > { %v1030_v62 = vmul.f32 1.442695, %v1027_v61 }
 0x41a   : > { %v1043_v63 = vpop.permute.xlu0 %1042  ;;  %v1197_v6 = vpop.permute.xlu1 %1196 }
 0x41b   : > { %3207 = vpow2.f32 %v1030_v62  ;;  %2977 = vmatpush3.msra.mxu0 %v1043_v63 }
 0x41c   : > { %2986 = vmatprep.subr.mxu0 %v3320_v40 }
 0x41e   : > { %v1275_v7 = vpop.permute.xlu1 %1274 }
 0x421   : > { %v3206_v0 = vpop.eup %3205 }
 0x422   : > { %v1032_v1 = vsel %vm866_vm5, %v3206_v0, 0.0 }
 0x423   : > { %1033 = vadd.xlane.f32.xlu0 %v1032_v1 }
 0x425   : > { %v3208_v2 = vpop.eup %3207 }
 0x426   : > { %v1035_v3 = vsel %vm866_vm5, %v3208_v2, 0.0 }
 0x427   : > { %1036 = vadd.xlane.f32.xlu1 %v1035_v3 }
 0x438   : > { %1272 = vrot.lane.b32.xlu1 %v3563_v49, %s3325_s29 }
 0x439   : > { %1194 = vrot.lane.b32.xlu0 %v3554_v47, %s3325_s29 }
 0x4b0   : > { %v1034_v8 = vpop.xlane.xlu0 %1033 }
 0x4b1   : > { %3209 = vrcp.f32 %v1034_v8 }
 0x4b4   : > { %v1037_v9 = vpop.xlane.xlu1 %1036  ;;  %v1195_v14 = vpop.permute.xlu0 %1194 }
 0x4b5   : > { %3211 = vrcp.f32 %v1037_v9 }
 0x4b8   : > { %v1273_v15 = vpop.permute.xlu1 %1272 }
 0x4bb   : > { %v3210_v10 = vpop.eup %3209 }
 0x4bc   : > { %v1039_v11 = vmul.f32 %v3210_v10, %v3206_v0 }
 0x4be   : > { %2979 = vmatmul.mubr.msk.f32.vlgmr.msra.gmra.mrb[0].mxu0 %vm866_vm5, %v1039_v11 }
 0x4bf   : > { %v3212_v12 = vpop.eup %3211  ;;  %2987 = vmatpush3.xpose.msk.msra.mxu0 %vm866_vm5, %v1197_v6  ;;  %2988 = vmatprep.mubr.msk.f32.mxu0 %vm3321_vm4, %v3320_v40 }
 0x4c0   : > { %v1041_v13 = vmul.f32 %v3212_v12, %v3208_v2  ;;  %2996 = vmatprep.subr.mxu0 %v3320_v40 }
 0x4c2   : > { %2984 = vmatmul.mubr.msk.f32.vlgmr.msra.gmra.mrb[6].mxu1 %vm866_vm5, %v1041_v13  ;;  %2989 = vmatmul.mubr.msk.f32.vlgmr.msra.gmra.mrb[2].mxu0 %vm866_vm5, %v1195_v14 }
 0x4c3   : > { %2992 = vmatpush3.xpose.msk.msra.mxu1 %vm866_vm5, %v1275_v7  ;;  %2993 = vmatprep.mubr.msk.f32.mxu1 %vm3321_vm4, %v3320_v40 }
 0x4c4   : > { %3001 = vmatprep.subr.mxu1 %v3320_v40  ;;  %2998 = vmatprep.mubr.msk.f32.mxu0 %vm3321_vm4, %v3320_v40 }
 0x4c6   : > { %2994 = vmatmul.mubr.msk.f32.vlgmr.msra.gmra.mrb[8].mxu1 %vm866_vm5, %v1273_v15 }
 0x4c7   : > { %3003 = vmatprep.mubr.msk.f32.mxu1 %vm3321_vm4, %v3320_v40 }
 0x591   : > { %v3598_v16 = vpop.f32.mrb[0].mxu0 }
 0x592   : > { %v2980_v17 = vpop.f32.mrb[1].mxu0 }
 0x595   : > { %v3600_v18 = vpop.f32.mrb[6].mxu1  ;;  %v1268_v19 = vpop.f32.mrb[2].mxu0 }
 0x596   : > { %v2985_v20 = vpop.f32.mrb[7].mxu1  ;;  %v2990_v21 = vpop.f32.mrb[3].mxu0  ;;  %v1350_v22 = vsel %vm866_vm5, %v1268_v19, -inf }
 0x597   : > { %1351 = vmax.xlane.f32.xlu0 %v1350_v22 }
 0x599   : > { %v1346_v23 = vpop.f32.mrb[8].mxu1 }
 0x59a   : > { %v2995_v24 = vpop.f32.mrb[9].mxu1  ;;  %v1353_v25 = vsel %vm866_vm5, %v1346_v23, -inf }
 0x59b   : > { %1354 = vmax.xlane.f32.xlu1 %v1353_v25 }
 0x5ac   : > { %1448 = vrot.lane.b32.xlu1 %v3546_v43, %s3326_s17 }
 0x5ad   : > { %1372 = vrot.lane.b32.xlu0 %v3548_v45, %s3326_s17  ;;  %s3846_s17 = scalar_lea.vmem %s3817_s7, %s3444_s15 }
 0x5b0   : > { %1526 = vrot.lane.b32.xlu1 %v3548_v45, %s3327_s25 }
 0x5b4   : > { %1604 = vrot.lane.b32.xlu1 %v3546_v43, %s3327_s25 }
 0x5b8   : > { %1602 = vrot.lane.b32.xlu1 %v3563_v49, %s3328_s0 }
 0x624   : > { %v1352_v26 = vpop.xlane.xlu0 %1351 }
 0x625   : > { %v1356_v27 = vsub.f32 %v1268_v19, %v1352_v26 }
 0x627   : > { %v1358_v28 = vmul.f32 1.442695, %v1356_v27 }
 0x628   : > { %v1373_v29 = vpop.permute.xlu0 %1372  ;;  %v1355_v30 = vpop.xlane.xlu1 %1354 }
 0x629   : > { %3213 = vpow2.f32 %v1358_v28  ;;  %v1357_v31 = vsub.f32 %v1346_v23, %v1355_v30  ;;  %2997 = vmatpush3.msra.mxu0 %v1373_v29 }
 0x62a   : > { %3006 = vmatprep.subr.mxu0 %v3320_v40 }
 0x62b   : > { %v1360_v32 = vmul.f32 1.442695, %v1357_v31 }
 0x62c   : > { %v1449_v33 = vpop.permute.xlu1 %1448 }
 0x62d   : > { %3215 = vpow2.f32 %v1360_v32  ;;  %3002 = vmatpush3.msra.mxu1 %v1449_v33 }
 0x62e   : > { %3011 = vmatprep.subr.mxu1 %v3320_v40 }
 0x630   : > { %v1527_v41 = vpop.permute.xlu1 %1526 }
 0x633   : > { %v3214_v34 = vpop.eup %3213 }
 0x634   : > { %v1362_v35 = vsel %vm866_vm5, %v3214_v34, 0.0  ;;  %v1605_v48 = vpop.permute.xlu1 %1604 }
 0x635   : > { %1363 = vadd.xlane.f32.xlu0 %v1362_v35 }
 0x637   : > { %v3216_v36 = vpop.eup %3215 }
 0x638   : > { %v1365_v37 = vsel %vm866_vm5, %v3216_v36, 0.0  ;;  %v1603_v52 = vpop.permute.xlu1 %1602 }
 0x639   : > { %1366 = vadd.xlane.f32.xlu0 %v1365_v37 }
 0x64f   : > { %1524 = vrot.lane.b32.xlu0 %v3554_v47, %s3328_s0 }
 0x6c2   : > { %v1364_v38 = vpop.xlane.xlu0 %1363 }
 0x6c3   : > { %3217 = vrcp.f32 %v1364_v38 }
 0x6c6   : > { %v1367_v39 = vpop.xlane.xlu0 %1366 }
 0x6c7   : > { %3219 = vrcp.f32 %v1367_v39 }
 0x6ca   : > { %v1525_v51 = vpop.permute.xlu0 %1524 }
 0x6cd   : > { %v3218_v42 = vpop.eup %3217 }
 0x6ce   : > { %v1369_v44 = vmul.f32 %v3218_v42, %v3214_v34 }
 0x6d0   : > { %2999 = vmatmul.mubr.msk.f32.vlgmr.msra.gmra.mrb[4].mxu0 %vm866_vm5, %v1369_v44 }
 0x6d1   : > { %v3220_v46 = vpop.eup %3219  ;;  %3007 = vmatpush3.xpose.msk.msra.mxu0 %vm866_vm5, %v1527_v41  ;;  %3008 = vmatprep.mubr.msk.f32.mxu0 %vm3321_vm4, %v3320_v40 }
 0x6d2   : > { %v1371_v50 = vmul.f32 %v3220_v46, %v3216_v36  ;;  %3016 = vmatprep.subr.mxu0 %v3320_v40 }
 0x6d4   : > { %3004 = vmatmul.mubr.msk.f32.vlgmr.msra.gmra.mrb[10].mxu1 %vm866_vm5, %v1371_v50  ;;  %3009 = vmatmul.mubr.msk.f32.vlgmr.msra.gmra.mrb[6].mxu0 %vm866_vm5, %v1525_v51 }
 0x6d5   : > { %3012 = vmatpush3.xpose.msk.msra.mxu1 %vm866_vm5, %v1605_v48  ;;  %3013 = vmatprep.mubr.msk.f32.mxu1 %vm3321_vm4, %v3320_v40 }
 0x6d6   : > { %3021 = vmatprep.subr.mxu1 %v3320_v40  ;;  %3018 = vmatprep.mubr.msk.f32.mxu0 %vm3321_vm4, %v3320_v40 }
 0x6d8   : > { %3014 = vmatmul.mubr.msk.f32.vlgmr.msra.gmra.mrb[12].mxu1 %vm866_vm5, %v1603_v52 }
 0x6d9   : > { %3023 = vmatprep.mubr.msk.f32.mxu1 %vm3321_vm4, %v3320_v40 }
 0x7a3   : > { %v3630_v53 = vpop.f32.mrb[4].mxu0 }
 0x7a4   : > { %v3000_v54 = vpop.f32.mrb[5].mxu0 }
 0x7a5   : > { %v2216_v54 = vld [vmem:[%s3467_s26] sm:$0xff] }
 0x7a7   : > { %v3632_v55 = vpop.f32.mrb[10].mxu1  ;;  %v1598_v56 = vpop.f32.mrb[6].mxu0 }
 0x7a8   : > { %v3005_v57 = vpop.f32.mrb[11].mxu1  ;;  %v3010_v58 = vpop.f32.mrb[7].mxu0  ;;  %v1680_v59 = vsel %vm866_vm5, %v1598_v56, -inf }
 0x7a9   : > { %1681 = vmax.xlane.f32.xlu0 %v1680_v59  ;;  %v2219_v57 = vld [vmem:[%s3467_s26 + $0x18] sm:$0xff] }
 0x7ab   : > { %v1676_v60 = vpop.f32.mrb[12].mxu1 }
 0x7ac   : > { %v3015_v61 = vpop.f32.mrb[13].mxu1  ;;  %v1683_v62 = vsel %vm866_vm5, %v1676_v60, -inf }
 0x7ad   : > { %1684 = vmax.xlane.f32.xlu1 %v1683_v62 }
 0x7be   : > { %1778 = vrot.lane.b32.xlu1 %v3546_v43, %s3329_s19 }
 0x7bf   : > { %1702 = vrot.lane.b32.xlu0 %v3548_v45, %s3329_s19 }
 0x7c2   : > { %1856 = vrot.lane.b32.xlu1 %v3548_v45, %s3330_s18 }
 0x7c6   : > { %1934 = vrot.lane.b32.xlu1 %v3546_v43, %s3330_s18 }
 0x7ca   : > { %1932 = vrot.lane.b32.xlu1 %v3563_v49, %s3331_s21 }
 0x836   : > { %v1682_v63 = vpop.xlane.xlu0 %1681 }
 0x837   : > { %v1686_v0 = vsub.f32 %v1598_v56, %v1682_v63  ;;  %v2218_v56 = vld [vmem:[%s3467_s26 + $0x10] sm:$0xff] }
 0x838   : > { %v3115_v58 = vpack.c.bf16 %v2219_v57, %v2218_v56  ;;  %v2467_v56 = vld [vmem:[%s3494_s30 + $0x18] sm:$0xff] }
 0x839   : > { %v1688_v1 = vmul.f32 1.442695, %v1686_v0 }
 0x83a   : > { %v1703_v2 = vpop.permute.xlu0 %1702  ;;  %v1685_v3 = vpop.xlane.xlu1 %1684 }
 0x83b   : > { %3221 = vpow2.f32 %v1688_v1  ;;  %v1687_v6 = vsub.f32 %v1676_v60, %v1685_v3  ;;  %3017 = vmatpush3.msra.mxu0 %v1703_v2 }
 0x83c   : > { %3026 = vmatprep.subr.mxu0 %v3320_v40 }
 0x83d   : > { %v1690_v7 = vmul.f32 1.442695, %v1687_v6 }
 0x83e   : > { %v1779_v8 = vpop.permute.xlu1 %1778 }
 0x83f   : > { %3223 = vpow2.f32 %v1690_v7  ;;  %3022 = vmatpush3.msra.mxu1 %v1779_v8 }
 0x840   : > { %3031 = vmatprep.subr.mxu1 %v3320_v40 }
 0x842   : > { %v1857_v14 = vpop.permute.xlu1 %1856 }
 0x845   : > { %v3222_v9 = vpop.eup %3221 }
 0x846   : > { %v1692_v10 = vsel %vm866_vm5, %v3222_v9, 0.0  ;;  %v1935_v20 = vpop.permute.xlu1 %1934 }
 0x847   : > { %1693 = vadd.xlane.f32.xlu0 %v1692_v10 }
 0x849   : > { %v3224_v49 = vpop.eup %3223 }
 0x84a   : > { %v1695_v11 = vsel %vm866_vm5, %v3224_v49, 0.0  ;;  %v1933_v22 = vpop.permute.xlu1 %1932 }
 0x84b   : > { %1696 = vadd.xlane.f32.xlu0 %v1695_v11 }
 0x861   : > { %1854 = vrot.lane.b32.xlu0 %v3554_v47, %s3331_s21 }
 0x8d4   : > { %v1694_v12 = vpop.xlane.xlu0 %1693 }
 0x8d5   : > { %3225 = vrcp.f32 %v1694_v12 }
 0x8d8   : > { %v1697_v13 = vpop.xlane.xlu0 %1696 }
 0x8d9   : > { %3227 = vrcp.f32 %v1697_v13 }
 0x8dc   : > { %v1855_v47 = vpop.permute.xlu0 %1854 }
 0x8df   : > { %v3226_v15 = vpop.eup %3225 }
 0x8e0   : > { %v1699_v17 = vmul.f32 %v3226_v15, %v3222_v9 }
 0x8e2   : > { %3019 = vmatmul.mubr.msk.f32.vlgmr.msra.gmra.mrb[8].mxu0 %vm866_vm5, %v1699_v17 }
 0x8e3   : > { %v3228_v19 = vpop.eup %3227  ;;  %3027 = vmatpush3.xpose.msk.msra.mxu0 %vm866_vm5, %v1857_v14  ;;  %3028 = vmatprep.mubr.msk.f32.mxu0 %vm3321_vm4, %v3320_v40 }
 0x8e4   : > { %v1701_v21 = vmul.f32 %v3228_v19, %v3224_v49  ;;  %3036 = vmatprep.subr.mxu0 %v3320_v40 }
 0x8e6   : > { %3024 = vmatmul.mubr.msk.f32.vlgmr.msra.gmra.mrb[14].mxu1 %vm866_vm5, %v1701_v21  ;;  %3029 = vmatmul.mubr.msk.f32.vlgmr.msra.gmra.mrb[10].mxu0 %vm866_vm5, %v1855_v47 }
 0x8e7   : > { %3032 = vmatpush3.xpose.msk.msra.mxu1 %vm866_vm5, %v1935_v20  ;;  %3033 = vmatprep.mubr.msk.f32.mxu1 %vm3321_vm4, %v3320_v40 }
 0x8e8   : > { %3041 = vmatprep.subr.mxu1 %v3320_v40  ;;  %3038 = vmatprep.mubr.msk.f32.mxu0 %vm3321_vm4, %v3320_v40 }
 0x8ea   : > { %3034 = vmatmul.mubr.msk.f32.vlgmr.msra.gmra.mrb[16].mxu1 %vm866_vm5, %v1933_v22 }
 0x8eb   : > { %3043 = vmatprep.mubr.msk.f32.mxu1 %vm3321_vm4, %v3320_v40 }
 0x9b5   : > { %v1774_v23 = vpop.f32.mrb[8].mxu0 }
 0x9b6   : > { %v3020_v24 = vpop.f32.mrb[9].mxu0 }
 0x9b9   : > { %v1850_v25 = vpop.f32.mrb[14].mxu1  ;;  %v1928_v26 = vpop.f32.mrb[10].mxu0 }
 0x9ba   : > { %v3025_v27 = vpop.f32.mrb[15].mxu1  ;;  %v3030_v28 = vpop.f32.mrb[11].mxu0  ;;  %v2010_v29 = vsel %vm866_vm5, %v1928_v26, -inf }
 0x9bb   : > { %2011 = vmax.xlane.f32.xlu0 %v2010_v29  ;;  %v2354_v28 = vld [vmem:[%s3484_s4] sm:$0xff]  ;;  %v2355_v29 = vld [vmem:[%s3484_s4 + $0x8] sm:$0xff] }
 0x9bd   : > { %v2006_v30 = vpop.f32.mrb[16].mxu1 }
 0x9be   : > { %v3035_v31 = vpop.f32.mrb[17].mxu1  ;;  %v2013_v32 = vsel %vm866_vm5, %v2006_v30, -inf }
 0x9bf   : > { %2014 = vmax.xlane.f32.xlu1 %v2013_v32  ;;  %v2356_v31 = vld [vmem:[%s3484_s4 + $0x10] sm:$0xff]  ;;  %v2357_v32 = vld [vmem:[%s3484_s4 + $0x18] sm:$0xff] }
 0x9d0   : > { %2108 = vrot.lane.b32.xlu1 %v3546_v43, %s3332_s1 }
 0x9d4   : > { %2186 = vrot.lane.b32.xlu1 %v3630_v53, %s3333_s24 }
 0x9d8   : > { %2188 = vrot.lane.b32.xlu1 %v3632_v55, %s3333_s24  ;;  %v2217_v55 = vld [vmem:[%s3467_s26 + $0x8] sm:$0xff] }
 0x9dc   : > { %2196 = vrot.lane.b32.xlu1 %v1850_v25, %s3334_s28 }
 0xa48   : > { %v2012_v40 = vpop.xlane.xlu0 %2011 }
 0xa49   : > { %v2016_v33 = vsub.f32 %v1928_v26, %v2012_v40  ;;  %v3123_v40 = vpack.c.bf16 %v2357_v32, %v2356_v31 }
 0xa4b   : > { %v2018_v34 = vmul.f32 1.442695, %v2016_v33 }
 0xa4c   : > { %v2015_v35 = vpop.xlane.xlu1 %2014 }
 0xa4d   : > { %3229 = vpow2.f32 %v2018_v34  ;;  %v2017_v36 = vsub.f32 %v2006_v30, %v2015_v35  ;;  %v3119_v30 = vpack.c.bf16 %v2355_v29, %v2354_v28 }
 0xa4f   : > { %v2020_v37 = vmul.f32 1.442695, %v2017_v36 }
 0xa50   : > { %v2109_v38 = vpop.permute.xlu1 %2108 }
 0xa51   : > { %3231 = vpow2.f32 %v2020_v37  ;;  %3042 = vmatpush3.msra.mxu1 %v2109_v38 }
 0xa54   : > { %v2187_v63 = vpop.permute.xlu1 %2186 }
 0xa55   : > { %v2208_v2 = vsel %vm866_vm5, %v3598_v16, %v2187_v63  ;;  %v2866_v16 = vld [vmem:[%s3846_s17] ss:$0 sm:$0xff] }
 0xa57   : > { %v3230_v39 = vpop.eup %3229 }
 0xa58   : > { %v2022_v43 = vsel %vm866_vm5, %v3230_v39, 0.0  ;;  %v2189_v0 = vpop.permute.xlu1 %2188 }
 0xa59   : > { %2023 = vadd.xlane.f32.xlu0 %v2022_v43  ;;  %v2209_v9 = vsel %vm866_vm5, %v3600_v18, %v2189_v0  ;;  %v2869_v43 = vld [vmem:[%s688_s16] ss:$0 sm:$0xff] }
 0xa5a   : > { %v2472_v0 = vld [vmem:[%s3494_s30 + $0x40] sm:$0xff] }
 0xa5b   : > { %v3232_v41 = vpop.eup %3231 }
 0xa5c   : > { %v2025_v42 = vsel %vm866_vm5, %v3232_v41, 0.0  ;;  %v2197_v3 = vpop.permute.xlu1 %2196 }
 0xa5d   : > { %2026 = vadd.xlane.f32.xlu0 %v2025_v42  ;;  %v2212_v10 = vsel %vm2210_vm7, %v2209_v9, %v2197_v3  ;;  %v2870_v42 = vld [vmem:[%s691_s22] ss:$0 sm:$0xff]  ;;  %v2477_v9 = vld [vmem:[%s3494_s30 + $0x68] sm:$0xff] }
 0xa73   : > { %2032 = vrot.lane.b32.xlu0 %v3548_v45, %s3332_s1  ;;  %v3111_v45 = vpack.c.bf16 %v2217_v55, %v2216_v54  ;;  %v2465_v54 = vld [vmem:[%s3494_s30 + $0x8] sm:$0xff]  ;;  %s3847_s1 = sld [smem:[#allocation15_spill]] (!%p2875_p5) }
 0xa75   : > { %3112 = vmatprep.subr.bf16.mxu1 %v3111_v45 }
 0xa77   : > { %2194 = vrot.lane.b32.xlu0 %v1774_v23, %s3334_s28  ;;  %s3848_s28 = sld [smem:[#allocation12_spill]] (!%p2875_p5) }
 0xae6   : > { %v2024_v44 = vpop.xlane.xlu0 %2023 }
 0xae7   : > { %3233 = vrcp.f32 %v2024_v44 }
 0xaea   : > { %v2027_v46 = vpop.xlane.xlu0 %2026 }
 0xaeb   : > { %3235 = vrcp.f32 %v2027_v46 }
 0xaee   : > { %v2033_v48 = vpop.permute.xlu0 %2032 }
 0xaef   : > { %3037 = vmatpush3.msra.mxu0 %v2033_v48 }
 0xaf1   : > { %v3234_v50 = vpop.eup %3233 }
 0xaf2   : > { %v2029_v51 = vmul.f32 %v3234_v50, %v3230_v39  ;;  %v2195_v1 = vpop.permute.xlu0 %2194 }
 0xaf3   : > { %v2211_v6 = vsel %vm2210_vm7, %v2208_v2, %v2195_v1  ;;  %v2473_v1 = vld [vmem:[%s3494_s30 + $0x48] sm:$0xff]  ;;  %v2474_v2 = vld [vmem:[%s3494_s30 + $0x50] sm:$0xff] }
 0xaf4   : > { %3039 = vmatmul.mubr.msk.f32.vlgmr.msra.gmra.mrb[12].mxu0 %vm866_vm5, %v2029_v51  ;;  %v3143_v3 = vpack.c.bf16 %v2473_v1, %v2472_v0 }
 0xaf5   : > { %v3236_v52 = vpop.eup %3235 }
 0xaf6   : > { %v2031_v53 = vmul.f32 %v3236_v52, %v3232_v41 }
 0xaf8   : > { %3044 = vmatmul.mubr.msk.f32.vlgmr.msra.gmra.mrb[18].mxu1 %vm866_vm5, %v2031_v53  ;;  %v2464_v53 = vld [vmem:[%s3494_s30] sm:$0xff] }
 0xaf9   : > { %3114 = vmatpush3.bf16.msra.mxu1 %v3111_v45  ;;  %v3127_v55 = vpack.c.bf16 %v2465_v54, %v2464_v53  ;;  %v2466_v45 = vld [vmem:[%s3494_s30 + $0x10] sm:$0xff] }
 0xafa   : > { %3116 = vmatprep.subr.bf16.mxu1 %v3115_v58  ;;  %v3131_v57 = vpack.c.bf16 %v2467_v56, %v2466_v45 }
 0xafb   : > { %3128 = vmatprep.subr.bf16.mxu0 %v3127_v55 }
 0xafc   : > { %3130 = vmatpush3.bf16.msra.mxu0 %v3127_v55 }
 0xafd   : > { %3118 = vmatpush3.bf16.msra.mxu1 %v3115_v58  ;;  %3132 = vmatprep.subr.bf16.mxu0 %v3131_v57  ;;  %v2468_v58 = vld [vmem:[%s3494_s30 + $0x20] sm:$0xff] }
 0xafe   : > { %3120 = vmatprep.subr.bf16.mxu1 %v3119_v30 }
 0xb00   : > { %3134 = vmatpush3.bf16.msra.mxu0 %v3131_v57 }
 0xbc7   : > { %v2104_v59 = vpop.f32.mrb[12].mxu0 }
 0xbc8   : > { %2202 = vrot.lane.b32.xlu0 %v2104_v59, %s3335_s14  ;;  %v3040_v60 = vpop.f32.mrb[13].mxu0  ;;  %v2469_v59 = vld [vmem:[%s3494_s30 + $0x28] sm:$0xff] }
 0xbc9   : > { %v3135_v60 = vpack.c.bf16 %v2469_v59, %v2468_v58 }
 0xbcb   : > { %v2180_v61 = vpop.f32.mrb[18].mxu1  ;;  %3136 = vmatprep.subr.bf16.mxu0 %v3135_v60 }
 0xbcc   : > { %2204 = vrot.lane.b32.xlu1 %v2180_v61, %s3335_s14  ;;  %v3045_v62 = vpop.f32.mrb[19].mxu1  ;;  %3138 = vmatpush3.bf16.msra.mxu0 %v3135_v60  ;;  %v2470_v61 = vld [vmem:[%s3494_s30 + $0x30] sm:$0xff] }
 0xbcd   : > { %v2471_v62 = vld [vmem:[%s3494_s30 + $0x38] sm:$0xff] }
 0xbce   : > { %v3139_v63 = vpack.c.bf16 %v2471_v62, %v2470_v61  ;;  %v2622_v62 = vld [vmem:[%s3848_s28] sm:$0x3] (!%p2875_p5) }
 0xbcf   : > { %vm2623_vm11 = vcmp.gt.s32.totalorder (!%p2875_p5), %v2622_v62, 0 }
 0xbd0   : > { %3140 = vmatprep.subr.bf16.mxu0 %v3139_v63  ;;  %v2624_v0 = vsel (!%p2875_p5), %vm2623_vm11, %v2622_v62, 0 }
 0xbd1   : > { %3142 = vmatpush3.bf16.msra.mxu0 %v3139_v63  ;;  %vm2625_vm12 = vcmp.lt.s32.totalorder (!%p2875_p5), %v2624_v0, 6 }
 0xbd2   : > { %3144 = vmatprep.subr.bf16.mxu0 %v3143_v3  ;;  %v2626_v1 = vsel (!%p2875_p5), %vm2625_vm12, %v2624_v0, 6 }
 0xbd5   : > { %3146 = vmatpush3.bf16.msra.mxu0 %v3143_v3 }
 0xc3a   : > { %v2203_v7 = vpop.permute.xlu0 %2202 }
 0xc3b   : > { %v2214_v8 = vsel %vm2213_vm6, %v2211_v6, %v2203_v7  ;;  %v2475_v6 = vld [vmem:[%s3494_s30 + $0x58] sm:$0xff] }
 0xc3c   : > { %3054 = vmatprep.mubr.msk.f32.mxu1 %vm725_vm3, %v2214_v8  ;;  %v3147_v7 = vpack.c.bf16 %v2475_v6, %v2474_v2  ;;  %v2476_v8 = vld [vmem:[%s3494_s30 + $0x60] sm:$0xff]  ;;  %v2627_v2 = vadd.s32 (!%p2875_p5), 1, %v2626_v1 }
 0xc3e   : > { %v2205_v49 = vpop.permute.xlu1 %2204  ;;  %3148 = vmatprep.subr.bf16.mxu0 %v3147_v7 }
 0xc3f   : > { %v2215_v11 = vsel %vm2213_vm6, %v2212_v10, %v2205_v49  ;;  %v3151_v10 = vpack.c.bf16 %v2477_v9, %v2476_v8  ;;  %v2478_v49 = vld [vmem:[%s3494_s30 + $0x70] sm:$0xff]  ;;  %3150 = vmatpush3.bf16.msra.mxu0 %v3147_v7 }
 0xc40   : > { %3055 = vmatmul.mubr.msk.f32.vlgmr.msra.gmra.mrb[20].mxu1 %vm725_vm3, %v2215_v11  ;;  %v2479_v11 = vld [vmem:[%s3494_s30 + $0x78] sm:$0xff] }
 0xc41   : > { %3122 = vmatpush3.bf16.msra.mxu1 %v3119_v30  ;;  %3152 = vmatprep.subr.bf16.mxu0 %v3151_v10 }
 0xc42   : > { %3124 = vmatprep.subr.bf16.mxu1 %v3123_v40 }
 0xc43   : > { %3154 = vmatpush3.bf16.msra.mxu0 %v3151_v10 }
 0xc45   : > { %3126 = vmatpush3.bf16.msra.mxu1 %v3123_v40 }
 0xd13   : > { %v3056_v12 = vpop.f32.mrb[20].mxu1 }
 0xd14   : > { %v2305_v13 = vadd.f32 %v3056_v12, %v2866_v16  ;;  %v2299_v14 = vpop.f32.mrb[21].mxu1  ;;  %v2871_v12 = vld [vmem:[%s699_s6] ss:$0 sm:$0xff] }
 0xd15   : > { %v2300_v15 = vadd.f32 %v2866_v16, %v2299_v14  ;;  %v3155_v16 = vpack.c.bf16 %v2479_v11, %v2478_v49 }
 0xd16   : > { %v3688_v17 = vadd.f32 %v2305_v13, %v3509_v5 }
 0xd17   : > { %v3691_v19 = vadd.f32 %v2300_v15, %v3507_v4  ;;  %3156 = vmatprep.subr.bf16.mxu0 %v3155_v16 }
 0xd18   : > { %v2315_v18 = vsel %vm725_vm3, %v3688_v17, 0.0  ;;  %3158 = vmatpush3.bf16.msra.mxu0 %v3155_v16 }
 0xd19   : > { %2316 = vadd.xlane.f32.xlu1 %v2315_v18  ;;  %v2312_v20 = vsel %vm725_vm3, %v3691_v19, 0.0 }
 0xd1a   : > { %2313 = vadd.xlane.f32.xlu0 %v2312_v20 }
 0xda6   : > { %v2317_v21 = vpop.xlane.xlu1 %2316 }
 0xda7   : > { %v2319_v47 = vmul.f32 0.03125, %v2317_v21  ;;  %v2314_v22 = vpop.xlane.xlu0 %2313 }
 0xda8   : > { %v2318_v5 = vmul.f32 0.03125, %v2314_v22 }
 0xda9   : > { %v2321_v23 = vsub.f32 %v3688_v17, %v2319_v47 }
 0xdaa   : > { %v2320_v4 = vsub.f32 %v3691_v19, %v2318_v5 }
 0xdab   : > { %v2323_v26 = vmul.f32 %v2321_v23, %v2321_v23 }
 0xdac   : > { %v2322_v24 = vmul.f32 %v2320_v4, %v2320_v4 }
 0xdad   : > { %v2327_v27 = vsel %vm725_vm3, %v2323_v26, 0.0 }
 0xdae   : > { %v2324_v25 = vsel %vm725_vm3, %v2322_v24, 0.0 }
 0xdaf   : > { %2325 = vadd.xlane.f32.xlu0 %v2324_v25 }
 0xdb3   : > { %2328 = vadd.xlane.f32.xlu0 %v2327_v27 }
 0xe3c   : > { %v2326_v33 = vpop.xlane.xlu0 %2325 }
 0xe3d   : > { %v2330_v34 = vmul.f32 0.03125, %v2326_v33 }
 0xe3f   : > { %v2332_v35 = vadd.f32 1e-05, %v2330_v34  ;;  %v2874_v34 = vld [vmem:[%s707_s20] ss:$0 sm:$0xff] }
 0xe40   : > { %v2329_v36 = vpop.xlane.xlu0 %2328 }
 0xe41   : > { %3237 = vrsqrt.f32 %v2332_v35  ;;  %v2331_v37 = vmul.f32 0.03125, %v2329_v36 }
 0xe43   : > { %v2333_v38 = vadd.f32 1e-05, %v2331_v37 }
 0xe45   : > { %3239 = vrsqrt.f32 %v2333_v38 }
 0xe4b   : > { %v3238_v39 = vpop.eup %3237 }
 0xe4c   : > { %v2336_v41 = vmul.f32 %v3238_v39, %v2320_v4 }
 0xe4e   : > { %v2344_v44 = vmul.f32 %v2869_v43, %v2336_v41  ;;  %v2876_v41 = vld [vmem:[%s3847_s1] ss:$0 sm:$0xff] (!%p2875_p5) }
 0xe4f   : > { %v3240_v46 = vpop.eup %3239 }
 0xe50   : > { %v2337_v48 = vmul.f32 %v3240_v46, %v2321_v23  ;;  %v2352_v50 = vadd.f32 %v2870_v42, %v2344_v44 }
 0xe52   : > { %v2345_v51 = vmul.f32 %v2869_v43, %v2337_v48  ;;  %3065 = vmatprep.mubr.msk.f32.mxu1 %vm725_vm3, %v2352_v50  ;;  %v2592_v50 = vlaneseq (!%p2875_p5) }
 0xe54   : > { %v2353_v52 = vadd.f32 %v2870_v42, %v2345_v51  ;;  %v2585_v42 = vld [vmem:[#allocation3] sm:$0x1] (!%p2875_p5)  ;;  %v2593_v51 = vand.u32 (!%p2875_p5), 127, %v2592_v50 }
 0xe55   : > { %3159 = vpush (!%p2875_p5), %v2585_v42 }
 0xe56   : > { %3066 = vmatmul.mubr.msk.f32.vlgmr.msra.gmra.mrb[22].mxu1 %vm725_vm3, %v2353_v52  ;;  %v2595_v52 = vshrl.u32 (!%p2875_p5), %v2592_v50, 7  ;;  %vm2607_vm10 = vcmp.ge.s32.totalorder (!%p2875_p5), %v2593_v51, 1 }
 0xe58   : > { %v2596_v55 = vsub.s32 (!%p2875_p5), %v2593_v51, %v2595_v52 }
 0xe86   : > { %s3160_s15 = spop (!%p2875_p5), %3159 }
 0xe87   : > { %v2587_v53 = vstv (!%p2875_p5), %s3160_s15 }
 0xf29   : > { %v3067_v13 = vpop.f32.mrb[22].mxu1 }
 0xf2a   : > { %v2443_v14 = vadd.f32 %v3067_v13, %v2871_v12  ;;  %v2437_v15 = vpop.f32.mrb[23].mxu1 }
 0xf2b   : > { %v2438_v18 = vadd.f32 %v2871_v12, %v2437_v15 }
 0xf2c   : > { %v2447_v20 = vmul.f32 %v2443_v14, %v2443_v14 }
 0xf2d   : > { %v2446_v21 = vmul.f32 %v2438_v18, %v2438_v18 }
 0xf2e   : > { %v2449_v47 = vmul.f32 %v2447_v20, %v2443_v14 }
 0xf2f   : > { %v2448_v22 = vmul.f32 %v2446_v21, %v2438_v18 }
 0xf30   : > { %v2451_v5 = vmul.f32 0.044715, %v2449_v47 }
 0xf31   : > { %v2450_v23 = vmul.f32 0.044715, %v2448_v22 }
 0xf32   : > { %v2453_v4 = vadd.f32 %v2451_v5, %v2443_v14 }
 0xf33   : > { %v2452_v24 = vadd.f32 %v2450_v23, %v2438_v18 }
 0xf34   : > { %v2455_v25 = vmul.f32 0.7978846, %v2453_v4 }
 0xf35   : > { %v2454_v26 = vmul.f32 0.7978846, %v2452_v24 }
 0xf36   : > { %3241 = vtanh.f32 %v2455_v25 }
 0xf37   : > { %3243 = vtanh.f32 %v2454_v26 }
 0xf40   : > { %v3242_v27 = vpop.eup %3241 }
 0xf41   : > { %v3244_v28 = vpop.eup %3243  ;;  %v2459_v29 = vadd.f32 1.0, %v3242_v27 }
 0xf42   : > { %v2458_v30 = vadd.f32 1.0, %v3244_v28 }
 0xf43   : > { %v2461_v31 = vmul.f32 0.5, %v2459_v29 }
 0xf44   : > { %v2460_v32 = vmul.f32 0.5, %v2458_v30 }
 0xf45   : > { %v2463_v33 = vmul.f32 %v2461_v31, %v2443_v14 }
 0xf46   : > { %v2462_v40 = vmul.f32 %v2460_v32, %v2438_v18 }
 0xf48   : > { %3100 = vmatprep.mubr.f32.mxu0 %v2462_v40 }
 0xf49   : > { %3101 = vmatmul.mubr.f32.vlgmr.msra.gmra.mrb[14].mxu0 %v2463_v33 }
0x101c   : > { %v3102_v35 = vpop.f32.mrb[14].mxu0  ;;  %2569 = sbr.rel (%p2875_p5) target bundleno = 4620 (0x120c), region = 92 }
0x101d   : > { %v2559_v36 = vadd.f32 %v3102_v35, %v2874_v34  ;;  %v2553_v37 = vpop.f32.mrb[15].mxu0 }
0x101e   : > { %v2554_v38 = vadd.f32 %v2874_v34, %v2553_v37 }
0x101f   : > { %v2563_v39 = vadd.f32 %v2559_v36, %v3688_v17 }
0x1020   : > { %v2562_v43 = vadd.f32 %v2554_v38, %v3691_v19  ;;  %v3336_v19 = vmov (!%p2875_p5), 0  }
0x1021   : > { %2565 = vst.msk [vmem:[#allocation2 + $0x8] sm:$0xff] %vm725_vm3, %v2563_v39  ;;  %v2578_v46 = vmul.f32 (!%p2875_p5), %v2876_v41, %v2563_v39  ;;  %3245 = vset.pattern.permute.xlu1 (!%p2875_p5), %v3336_v19  ;;  %3246 = vset.pattern.permute.xlu0 (!%p2875_p5), %v3336_v19 }
0x1022   : > { %2564 = vst.msk [vmem:[#allocation2] sm:$0xff] %vm725_vm3, %v2562_v43  ;;  %v2577_v44 = vmul.f32 (!%p2875_p5), %v2876_v41, %v2562_v43 }
0x1023   : > { %v2582_v17 = vsel %vm725_vm3, %v2578_v46, 0.0 }
0x1024   : > { %v2579_v48 = vsel %vm725_vm3, %v2577_v44, 0.0 }
0x1025   : > { %2580 = vadd.xlane.f32.xlu0 %v2579_v48 }
0x1029   : > { %2583 = vadd.xlane.f32.xlu0 %v2582_v17 }
0x10b2   : > { %v2581_v54 = vpop.xlane.xlu0 %2580 }
0x10b3   : > { %v2588_v45 = vadd.f32 %v2587_v53, %v2581_v54 }
0x10b5   : > { %v2597_v58 = vrot.slane %v2588_v45, %v2596_v55 }
0x10b6   : > { %v2584_v56 = vpop.xlane.xlu0 %2583 }
0x10b7   : > { %v2589_v57 = vadd.f32 %v2587_v53, %v2584_v56 }
0x10b9   : > { %v2601_v59 = vrot.slane %v2589_v57, %v2596_v55 }
0x10bb   : > { %v2603_v60 = vsel %vm2602_vm8, %v2601_v59, %v2597_v58 }
0x10bc   : > { %v2608_v61 = vsel %vm2607_vm10, %v2603_v60, -1e+30  ;;  %2606 = vst.msk [vmem:[#allocation4] sm:$0x3] %vm2605_vm9, %v2603_v60 }
0x10bd   : > { %v2609_v63 = vsel %vm2605_vm9, %v2608_v61, -inf }
0x10be   : > { %2610 = vmax.xlane.f32.xlu1 %v2609_v63 }
0x10cf   : > { %2629 = vperm.xlu1 %3245, %v2627_v2  }
0x114b   : > { %v2611_v3 = vpop.xlane.xlu1 %2610 }
0x114c   : > { %v2612_v6 = vsub.f32 %v2608_v61, %v2611_v3 }
0x114e   : > { %v2613_v7 = vmul.f32 1.442695, %v2612_v6 }
0x114f   : > { %v2630_v8 = vpop.permute.xlu1 %2629 }
0x1150   : > { %3247 = vpow2.f32 %v2613_v7  ;;  %vm2631_vm13 = vcmp.eq.s32.totalorder %v2593_v51, %v2630_v8 }
0x1151   : > { %v2632_v11 = vsel %vm2631_vm13, %v2603_v60, 0.0 }
0x1152   : > { %v2633_v16 = vsel %vm2605_vm9, %v2632_v11, 0.0 }
0x115a   : > { %v3248_v9 = vpop.eup %3247 }
0x115b   : > { %v2615_v10 = vsel %vm2607_vm10, %v3248_v9, 0.0 }
0x115c   : > { %v2616_v49 = vsel %vm2605_vm9, %v2615_v10, 0.0 }
0x115d   : > { %2617 = vadd.xlane.f32.xlu0 %v2616_v49 }
0x1161   : > { %2634 = vadd.xlane.f32.xlu0 %v2633_v16 }
0x11ea   : > { %v2618_v12 = vpop.xlane.xlu0 %2617 }
0x11eb   : > { %3249 = vlog2.f32 %v2618_v12 }
0x11ee   : > { %v2635_v18 = vpop.xlane.xlu0 %2634 }
0x11f5   : > { %v3250_v13 = vpop.eup %3249 }
0x11f6   : > { %v2620_v14 = vmul.f32 0.6931472, %v3250_v13 }
0x11f8   : > { %v2621_v15 = vadd.f32 %v2620_v14, %v2611_v3 }
0x11fa   : > { %v2636_v20 = vsub.f32 %v2621_v15, %v2635_v18 }
0x11fc   : > { %v2638_v21 = vsel %vm2637_vm14, %v2636_v20, 0.0 }
0x11fd   : > { %v2639_v47 = vrot.slane %v2638_v21, 4 }
0x11ff   : > { %v2640_v22 = vadd.f32 %v2639_v47, %v2638_v21 }
0x1201   : > { %v2641_v5 = vrot.slane %v2640_v22, 2 }
0x1203   : > { %v2642_v23 = vadd.f32 %v2641_v5, %v2640_v22 }
0x1205   : > { %v2643_v4 = vrot.slane %v2642_v23, 1 }
0x1207   : > { %v2644_v24 = vadd.f32 %v2643_v4, %v2642_v23 }
0x1209   : > { %v2645_v25 = vmul.f32 0.5, %v2644_v24 }
0x120b   : > { %2647 = vst.msk [vmem:[#allocation6] sm:$0x1] %vm2646_vm15, %v2645_v25 }
0x120c PF: > { %p3169_p6 = scmp.eq.s32.totalorder %s3438_s27, 1  ;;  %s3337_s14 = smov [#allocation4]  }
0x120d   : > { %s2655_s26 = sshll.u32 %s3337_s14, 4  ;;  %s3338_s29 = smov [#allocation6]   ;;  %s2656_s26 = int_to_ptr.vmem [resolvable:$true] %s2655_s26 }
0x120e   : > { %s2666_s17 = sshll.u32 %s3338_s29, 4  ;;  %s3251_s25 = scalar_lea.vmem %s2656_s26, 32  ;;  %s2667_s17 = int_to_ptr.vmem [resolvable:$true] %s2666_s17 }
0x120f   : > { %p3252_p7 = scmp.ne.s32.totalorder %s2656_s26, %s3251_s25  ;;  %p3258_p10 = scmp.lt.s32.totalorder %s2656_s26, %s2656_s26 }
0x1210   : > { %p3259_p11 = scmp.lt.s32.totalorder %s3251_s25, %s3251_s25 }
0x1211   : > { %p3253_p8 = pnand %p3252_p7, %p3169_p6 }
0x1212   : > { %p3260_p12 = por %p3259_p11, %p3258_p10 }
0x1213   : > { %p3254_p9 = pneg %p3253_p8 }
0x1215   : > { %p3261_p13 = pnand %p3260_p12, %p3254_p9 }
0x1217   : > { %3264 = shalt.err (!%p3261_p13)
}
0x1218   : > { %s3849_s19 = sld [smem:[#allocation16_spill]] }
0x121e   : > { %s3265_s16 = scalar_lea.hbm %s3849_s19, 32 }
0x121f   : > { %p3266_p0 = scmp.ne.s32.totalorder %s3849_s19, %s3265_s16  ;;  %p3271_p3 = scmp.lt.u32.totalorder %s3265_s16, %s3849_s19 }
0x1221   : > { %p3267_p1 = pnand %p3266_p0, %p3169_p6 }
0x1223   : > { %p3268_p2 = pneg %p3267_p1 }
0x1225   : > { %p3273_p4 = pnand %p3271_p3, %p3268_p2 }
0x1227   : > { %3276 = shalt.err (!%p3273_p4)
}
0x1228   : > { %3162 = dma.vmem_to_hbm [thread:$0]  (%p3169_p6), %s2656_s26, 32, %s3849_s19, [#allocation5]  }
0x1229   : > { %s3277_s15 = scalar_lea.vmem %s2667_s17, 16  ;;  %s3283_s20 = scalar_lea.vmem %s2667_s17, 32 }
0x122a   : > { %p3278_p5 = scmp.ne.s32.totalorder %s2667_s17, %s3277_s15  ;;  %p3284_p9 = scmp.lt.s32.totalorder %s2667_s17, %s2667_s17 }
0x122b   : > { %p3285_p10 = scmp.lt.s32.totalorder %s3283_s20, %s3277_s15 }
0x122c   : > { %p3279_p7 = pnand %p3278_p5, %p3169_p6 }
0x122d   : > { %p3286_p11 = por %p3285_p10, %p3284_p9 }
0x122e   : > { %p3280_p8 = pneg %p3279_p7 }
0x1230   : > { %p3287_p12 = pnand %p3286_p11, %p3280_p8 }
0x1232   : > { %3290 = shalt.err (!%p3287_p12)
}
0x1233   : > { %s3850_s14 = sld [smem:[#allocation17_spill]] }
0x1239   : > { %s3291_s29 = scalar_lea.hbm %s3850_s14, 16 }
0x123a   : > { %p3292_p13 = scmp.ne.s32.totalorder %s3850_s14, %s3291_s29  ;;  %p3297_p2 = scmp.lt.u32.totalorder %s3291_s29, %s3850_s14 }
0x123c   : > { %p3293_p0 = pnand %p3292_p13, %p3169_p6 }
0x123e   : > { %p3294_p1 = pneg %p3293_p0 }
0x1240   : > { %p3299_p3 = pnand %p3297_p2, %p3294_p1 }
0x1242   : > { %3302 = shalt.err (!%p3299_p3)
}
0x1243   : > { %3164 = dma.vmem_to_hbm [thread:$0]  (%p3169_p6), %s2667_s17, 16, %s3850_s14, [#allocation7]  }
0x1244   : > { %3308 = dma.done.wait (%p3169_p6), [#allocation5], 32  }
0x1245   : > { %3310 = vsyncadd (%p3169_p6), [#allocation5], 4294967264 }
0x1246   : > { %3312 = dma.done.wait (%p3169_p6), [#allocation7], 16  }
0x1247   : > { %3314 = vsyncadd (%p3169_p6), [#allocation7], 4294967280 }
0x1248 PF: > { %s3851_s6 = sld [smem:[#allocation10_spill]] }
0x124e   : > { %s32_s26 = sadd.s32 1, %s3851_s6  }
0x124f   : > { %p29_p4 = scmp.ge.s32.totalorder %s32_s26, 4  }
0x1251   :  { %31 = sbr.rel (!%p29_p4) target bundleno = 10 (0xa), region = 160 }
0x1258   :  { %2683 = vsyncpa [#allocation5], 1 }
0x1259   :  { %2685 = vsyncpa [#allocation5 + $0x1], 1 }
0x125a   :  { %2686 = vsyncpa [#allocation7], 1 }

</bundles_post_ra>
